<compile_context>
chip_gen: v5e
topology: v5e:2x2
jax: 0.10.0
libtpu: 0.0.40
codegen_flags: <defaults>
</compile_context>

<pallas_src>
import numpy as np
import jax
import jax.numpy as jnp
from jax.experimental import pallas as pl
from jax.experimental.pallas import tpu as pltpu

# ----------------------- SMPLX constants (as in the module) -----------------------
HEAD_KIN_CHAIN = np.array([15, 12, 9, 6, 3, 0], dtype=np.int32)

# SMPLX kinematic tree (55 joints), parents[0] = -1 as in __init__
PARENTS = np.array(
    [-1, 0, 0, 0, 1, 2, 3, 4, 5, 6, 7, 8, 9, 9, 9, 12, 13, 14, 16, 17, 18, 19,
     15, 15, 15,
     20, 25, 26, 20, 28, 29, 20, 31, 32, 20, 34, 35, 20, 37, 38,
     21, 40, 41, 21, 43, 44, 21, 46, 47, 21, 49, 50, 21, 52, 53], dtype=np.int32)

# Derived exactly as in __init__ from SMPLX_names vs J14_NAMES
SOURCE_IDXS = np.array([1, 2, 4, 5, 7, 8, 12, 15, 16, 17, 18, 19, 20, 21], dtype=np.int32)
TARGET_IDXS = np.array([3, 2, 4, 1, 5, 0, 12, 13, 9, 8, 10, 7, 11, 6], dtype=np.int32)

# ----------------------- small synthetic model sizes -----------------------
BATCH = 2
NUM_JOINTS = 55
NUM_VERTS = 512            # multiple of 128 -> lane-dense
NUM_FACES = 1024
N_SHAPE = 10
N_EXP = 10
N_BETAS = N_SHAPE + N_EXP
NUM_POSE_BASIS = (NUM_JOINTS - 1) * 9      # 486
NUM_BLEND = N_BETAS + NUM_POSE_BASIS       # 506
NUM_STATIC_LMK = 51
NUM_DYN_LMK = 17
NUM_DYN_BINS = 79
NUM_J14 = 14

VERT_TILE = 256            # vertex lane-tile (multiple of 128); 2 grid steps at V=512

F32 = jnp.float32
BF16 = jnp.bfloat16


# ----------------------- kinematic-tree depth levels (trace-time) -----------------------
def _kinematic_levels(parents):
    depth = np.zeros(len(parents), dtype=np.int64)
    for i in range(1, len(parents)):
        depth[i] = depth[parents[i]] + 1
    levels = []
    for d in range(1, int(depth.max()) + 1):
        idxs = np.where(depth == d)[0].astype(np.int32)
        levels.append((idxs, parents[idxs].astype(np.int32)))
    return levels


KIN_LEVELS = _kinematic_levels(PARENTS)     # ~10 depth-batched levels instead of 54 matmuls


# ================================ fused Pallas kernel ================================
def _smplx_fused_kernel(bp_ref, bases_ref, vtpl_ref, a_flat_ref, w_t_ref, ereg_ref,
                        verts_ref, regj_ref):
    """Fused blendshapes + LBS skinning + 14-joint regression for one vertex tile.

    Per grid step (vertex tile of TV verts, coordinate-major within the tile):
      bp      (B, 506)     bf16  [betas | pose_feature]
      bases   (506, 3*TV)  bf16  combined shape+pose blendshape basis
      vtpl    (1, 3*TV)    f32   template vertices
      a_flat  (12B, J)     f32   row k*3B + i*B + b = A[b, :, i, k] (top 3x4 rows only)
      w_t     (J, TV)      f32   LBS weights, transposed
      ereg    (TV, 14)     f32   extra joint regressor, transposed
    outputs:
      verts   (3B, TV)     f32   row i*B + b = vertex coordinate i of batch b
      regj    (3B, 14)     f32   accumulated across the vertex-tile grid axis
    """
    B = bp_ref.shape[0]
    TV = w_t_ref.shape[1]

    # one MXU call for shape+pose blendshapes (K=506), f32 accumulation
    vposed = vtpl_ref[...] + jnp.dot(bp_ref[...], bases_ref[...],
                                     preferred_element_type=jnp.float32)     # (B, 3TV)

    # skinning transforms T^T, component-major: single MXU push with M = 12B
    T_all = jnp.dot(a_flat_ref[...], w_t_ref[...],
                    preferred_element_type=jnp.float32)                      # (12B, TV)
    rows = 3 * B
    T0 = T_all[0 * rows:1 * rows]        # (3B, TV) : T[b, v, i, 0]
    T1 = T_all[1 * rows:2 * rows]        #            T[b, v, i, 1]
    T2 = T_all[2 * rows:3 * rows]        #            T[b, v, i, 2]
    T3 = T_all[3 * rows:4 * rows]        #            T[b, v, i, 3] (translation)

    # replicated per-coordinate vertex slabs (3B, TV); row i*B + b = coord of batch b
    vx = vposed[:, 0 * TV:1 * TV]
    vy = vposed[:, 1 * TV:2 * TV]
    vz = vposed[:, 2 * TV:3 * TV]
    Vx = jnp.concatenate([vx, vx, vx], axis=0)
    Vy = jnp.concatenate([vy, vy, vy], axis=0)
    Vz = jnp.concatenate([vz, vz, vz], axis=0)

    # per-vertex affine on full-width slabs, one lane-dense store
    verts = T0 * Vx + T1 * Vy + T2 * Vz + T3                                 # (3B, TV)
    verts_ref[...] = verts

    # extra 14-joint regression: one matmul per tile, accumulated over tiles
    @pl.when(pl.program_id(0) == 0)
    def _():
        regj_ref[...] = jnp.zeros_like(regj_ref)
    regj_ref[...] += jnp.dot(verts, ereg_ref[...], preferred_element_type=jnp.float32)


def smplx_vertices_pallas(prep, betas_posefeat, A):
    """Single fused pallas_call: blendshapes + skinning + extra joint regression."""
    B = betas_posefeat.shape[0]
    J, V = prep['lbs_w_t'].shape
    TV = prep['bases'].shape[-1] // 3
    NT = V // TV
    R = prep['extra_reg_t'].shape[-1]

    # drop the dead bottom [0,0,0,1] row of each 4x4; order rows (k, i, b) so
    # T_all splits into four (3B, V) component slabs with no in-kernel relayout
    a_flat = A[:, :, :3, :].transpose(3, 2, 0, 1).reshape(12 * B, J)

    verts_flat, regj_flat = pl.pallas_call(
        _smplx_fused_kernel,
        grid=(NT,),
        in_specs=[
            pl.BlockSpec((B, NUM_BLEND), lambda i: (0, 0)),
            pl.BlockSpec((None, NUM_BLEND, 3 * TV), lambda i: (i, 0, 0)),
            pl.BlockSpec((None, 1, 3 * TV), lambda i: (i, 0, 0)),
            pl.BlockSpec((12 * B, J), lambda i: (0, 0)),
            pl.BlockSpec((J, TV), lambda i: (0, i)),
            pl.BlockSpec((TV, R), lambda i: (i, 0)),
        ],
        out_specs=(
            pl.BlockSpec((3 * B, TV), lambda i: (0, i)),
            pl.BlockSpec((3 * B, R), lambda i: (0, 0)),     # resident accumulator
        ),
        out_shape=(jax.ShapeDtypeStruct((3 * B, V), F32),
                   jax.ShapeDtypeStruct((3 * B, R), F32)),
        compiler_params=pltpu.CompilerParams(
            dimension_semantics=("arbitrary",),             # regj accumulates over tiles
            vmem_limit_bytes=32 * 1024 * 1024),
    )(betas_posefeat, prep['bases'], prep['v_template_t'], a_flat,
      prep['lbs_w_t'], prep['extra_reg_t'])

    verts_cm = verts_flat.reshape(3, B, V).transpose(1, 0, 2)       # (B, 3, V) coord-major
    reg_joints = regj_flat.reshape(3, B, R).transpose(1, 2, 0)      # (B, 14, 3)
    return verts_cm, reg_joints


# ================================ plain-JAX glue ================================
def batch_rigid_transform(rot_mats, joints, parents, levels):
    """Depth-batched kinematic chain. rot_mats (B,J,3,3), joints (B,J,3)."""
    B, J = joints.shape[:2]
    joints_e = joints[..., None]                                    # (B,J,3,1)
    rel_joints = joints_e.at[:, 1:].set(joints_e[:, 1:] - joints_e[:, np.asarray(parents[1:])])
    top = jnp.concatenate([rot_mats, rel_joints], axis=-1)          # (B,J,3,4)
    bottom = jnp.broadcast_to(jnp.array([0., 0., 0., 1.], dtype=rot_mats.dtype), (B, J, 1, 4))
    transforms_mat = jnp.concatenate([top, bottom], axis=-2)        # (B,J,4,4)
    world = transforms_mat                                          # root already correct
    for child_idx, parent_idx in levels:
        upd = jnp.matmul(world[:, parent_idx], transforms_mat[:, child_idx])
        world = world.at[:, child_idx].set(upd)
    posed_joints = world[:, :, :3, 3]
    joints_h = jnp.concatenate([joints_e, jnp.zeros_like(joints_e[:, :, :1])], axis=2)
    init_bone = jnp.matmul(world, joints_h)                         # (B,J,4,1)
    init_bone = jnp.concatenate(
        [jnp.zeros((B, J, 4, 3), dtype=rot_mats.dtype), init_bone], axis=-1)
    return posed_joints, world - init_bone


def batch_rigid_transform_naive(rot_mats, joints, parents):
    """Original sequential 54-step chain (reference path only)."""
    B, J = joints.shape[:2]
    joints_e = joints[..., None]
    rel_joints = joints_e.at[:, 1:].set(joints_e[:, 1:] - joints_e[:, np.asarray(parents[1:])])
    top = jnp.concatenate([rot_mats, rel_joints], axis=-1)
    bottom = jnp.broadcast_to(jnp.array([0., 0., 0., 1.], dtype=rot_mats.dtype), (B, J, 1, 4))
    transforms_mat = jnp.concatenate([top, bottom], axis=-2)
    chain = [transforms_mat[:, 0]]
    for i in range(1, J):
        chain.append(jnp.matmul(chain[int(parents[i])], transforms_mat[:, i]))
    transforms = jnp.stack(chain, axis=1)
    posed_joints = transforms[:, :, :3, 3]
    joints_h = jnp.concatenate([joints_e, jnp.zeros_like(joints_e[:, :, :1])], axis=2)
    init_bone = jnp.matmul(transforms, joints_h)
    init_bone = jnp.concatenate(
        [jnp.zeros((B, J, 4, 3), dtype=rot_mats.dtype), init_bone], axis=-1)
    return posed_joints, transforms - init_bone


def rot_mat_to_euler(rot_mats):
    return jnp.arctan2(-rot_mats[:, 2, 0],
                       jnp.sqrt(rot_mats[:, 0, 0] ** 2 + rot_mats[:, 1, 0] ** 2))


def find_dynamic_lmk_idx_and_bcoords(full_pose, dyn_faces_idx, dyn_bary, head_kin_chain):
    B = full_pose.shape[0]
    rot_mats = full_pose[:, np.asarray(head_kin_chain)]             # (B,6,3,3)
    rel = jnp.broadcast_to(jnp.eye(3, dtype=full_pose.dtype), (B, 3, 3))
    for idx in range(len(head_kin_chain)):
        rel = jnp.matmul(rot_mats[:, idx], rel)
    y = jnp.round(jnp.minimum(-rot_mat_to_euler(rel) * 180.0 / np.pi, 39.0)).astype(jnp.int32)
    neg_mask = (y < 0).astype(jnp.int32)
    mask = (y < -39).astype(jnp.int32)
    neg_vals = mask * 78 + (1 - mask) * (39 - y)
    y = neg_mask * neg_vals + (1 - neg_mask) * y
    return dyn_faces_idx[y], dyn_bary[y]


def vertices2landmarks(vertices, faces, lmk_faces_idx, lmk_bary_coords):
    """Reference-path landmark gather on (B, V, 3) vertices."""
    B = vertices.shape[0]
    lmk_faces = faces[lmk_faces_idx]                                # (B,L,3)
    lmk_vertices = vertices[jnp.arange(B)[:, None, None], lmk_faces]  # (B,L,3,3)
    return jnp.einsum('blfi,blf->bli', lmk_vertices, lmk_bary_coords)


def vertices2landmarks_cm(vertices_cm, faces, lmk_faces_idx, lmk_bary_coords):
    """Landmark gather on coordinate-major (B, 3, V) vertices (no big relayout)."""
    lmk_faces = faces[lmk_faces_idx]                                # (B,L,3) vertex ids

    def gather_one(vc, lf):                                         # (3,V), (L,3)
        return vc[:, lf]                                            # (3,L,3)

    lmk_vertices = jax.vmap(gather_one)(vertices_cm, lmk_faces)     # (B,3,L,3)
    return jnp.einsum('bklf,blf->blk', lmk_vertices, lmk_bary_coords)


# ================================ setup (runs once) ================================
def prepare_smplx_params(params, vert_tile=VERT_TILE):
    """One-time weight re-layouts + composite joint regressor (outside the jitted fwd)."""
    V = params['v_template'].shape[0]
    assert V % vert_tile == 0, "toy config keeps V a multiple of the vertex tile"
    NT = V // vert_tile
    nb = params['shapedirs'].shape[-1]
    npb = params['posedirs'].shape[0]

    # combined shape+pose blendshape basis: (NT, 506, 3*TV), coord-major per tile, bf16
    sd = params['shapedirs'].transpose(2, 1, 0)                     # (20, 3, V)
    pd = params['posedirs'].reshape(npb, V, 3).transpose(0, 2, 1)   # (486, 3, V)
    comb = jnp.concatenate([sd, pd], axis=0)                        # (506, 3, V)
    bases = (comb.reshape(nb + npb, 3, NT, vert_tile)
             .transpose(2, 0, 1, 3)
             .reshape(NT, nb + npb, 3 * vert_tile)
             .astype(BF16))

    vt = params['v_template'].T                                     # (3, V)
    v_template_t = (vt.reshape(3, NT, vert_tile).transpose(1, 0, 2)
                    .reshape(NT, 1, 3 * vert_tile))                 # (NT, 1, 3*TV) f32

    # composite 55-joint regressor (exact: J_regressor is linear in v_shaped)
    j_template = params['J_regressor'] @ params['v_template']       # (55, 3)
    j_shapedirs = jnp.einsum('jv,vkl->jkl', params['J_regressor'], params['shapedirs'])

    return dict(
        bases=bases,
        v_template_t=v_template_t,
        lbs_w_t=params['lbs_weights'].T,                            # (J, V)
        extra_reg_t=params['extra_joint_regressor'].T,              # (V, 14)
        j_template=j_template,
        j_shapedirs=j_shapedirs,                                    # (55, 3, 20)
        faces=params['faces'],
        lmk_faces_idx=params['lmk_faces_idx'],
        lmk_bary_coords=params['lmk_bary_coords'],
        dynamic_lmk_faces_idx=params['dynamic_lmk_faces_idx'],
        dynamic_lmk_bary_coords=params['dynamic_lmk_bary_coords'],
        transl=params['transl'],
    )


# ================================ SMPLX forward ================================
def smplx_forward(prep, shape_params, expression_params, full_pose):
    B = shape_params.shape[0]
    betas = jnp.concatenate([shape_params, expression_params], axis=1)       # (B, 20)
    ident = jnp.eye(3, dtype=F32)
    pose_feature = (full_pose[:, 1:] - ident).reshape(B, -1)                 # (B, 486)
    betas_posefeat = jnp.concatenate([betas, pose_feature], axis=1).astype(BF16)

    # exact 55-joint regression via the precomputed composite regressor (f32)
    J = prep['j_template'][None] + jnp.einsum('bl,jkl->bjk', betas, prep['j_shapedirs'])
    J_transformed, A = batch_rigid_transform(full_pose, J, PARENTS, KIN_LEVELS)

    # fused Pallas kernel: blendshapes + LBS skinning + extra 14-joint regression
    verts_cm, reg_joints = smplx_vertices_pallas(prep, betas_posefeat, A)    # (B,3,V),(B,14,3)

    # landmarks, gathered directly from coordinate-major vertices
    lmk_faces_idx = jnp.broadcast_to(prep['lmk_faces_idx'][None], (B, NUM_STATIC_LMK))
    lmk_bary = jnp.broadcast_to(prep['lmk_bary_coords'][None], (B, NUM_STATIC_LMK, 3))
    dyn_idx, dyn_bary = find_dynamic_lmk_idx_and_bcoords(
        full_pose, prep['dynamic_lmk_faces_idx'], prep['dynamic_lmk_bary_coords'],
        HEAD_KIN_CHAIN)
    lmk_faces_idx = jnp.concatenate([lmk_faces_idx, dyn_idx], axis=1)
    lmk_bary = jnp.concatenate([lmk_bary, dyn_bary], axis=1)
    landmarks = vertices2landmarks_cm(verts_cm, prep['faces'], lmk_faces_idx, lmk_bary)

    # joint assembly + J14 regressor override
    joints = jnp.concatenate([J_transformed, landmarks], axis=1)             # (B, 123, 3)
    joints = joints.at[:, SOURCE_IDXS].set(reg_joints[:, TARGET_IDXS])

    t = prep['transl']                                                       # (1, 3) zeros
    joints = joints + t[:, None, :]
    verts_cm = verts_cm + t[:, :, None]
    vertices = verts_cm.transpose(0, 2, 1)        # single (B, V, 3) relayout at the end
    return vertices, landmarks, joints


# ================================ pure-JAX reference ================================
def smplx_forward_reference(params, shape_params, expression_params, full_pose):
    B = shape_params.shape[0]
    V = params['v_template'].shape[0]
    betas = jnp.concatenate([shape_params, expression_params], axis=1)
    shape_off = jnp.einsum('bl,mkl->bmk', betas, params['shapedirs'])
    v_shaped = params['v_template'][None] + shape_off
    J = jnp.einsum('bik,ji->bjk', v_shaped, params['J_regressor'])
    ident = jnp.eye(3, dtype=F32)
    pose_feature = (full_pose[:, 1:] - ident).reshape(B, -1)
    pose_off = jnp.matmul(pose_feature, params['posedirs']).reshape(B, V, 3)
    v_posed = v_shaped + pose_off
    J_transformed, A = batch_rigid_transform_naive(full_pose, J, PARENTS)
    T = jnp.einsum('vj,bjk->bvk', params['lbs_weights'], A.reshape(B, NUM_JOINTS, 16))
    T = T.reshape(B, V, 4, 4)
    vh = jnp.concatenate([v_posed, jnp.ones((B, V, 1), F32)], axis=-1)
    vertices = jnp.matmul(T, vh[..., None])[:, :, :3, 0]
    reg_joints = jnp.einsum('ji,bik->bjk', params['extra_joint_regressor'], vertices)

    lmk_faces_idx = jnp.broadcast_to(params['lmk_faces_idx'][None], (B, NUM_STATIC_LMK))
    lmk_bary = jnp.broadcast_to(params['lmk_bary_coords'][None], (B, NUM_STATIC_LMK, 3))
    dyn_idx, dyn_bary = find_dynamic_lmk_idx_and_bcoords(
        full_pose, params['dynamic_lmk_faces_idx'], params['dynamic_lmk_bary_coords'],
        HEAD_KIN_CHAIN)
    lmk_faces_idx = jnp.concatenate([lmk_faces_idx, dyn_idx], axis=1)
    lmk_bary = jnp.concatenate([lmk_bary, dyn_bary], axis=1)
    landmarks = vertices2landmarks(vertices, params['faces'], lmk_faces_idx, lmk_bary)
    joints = jnp.concatenate([J_transformed, landmarks], axis=1)
    joints = joints.at[:, SOURCE_IDXS].set(reg_joints[:, TARGET_IDXS])
    t = params['transl'][:, None, :]
    return vertices + t, landmarks, joints + t


# ================================ input generation ================================
def batch_rodrigues(rvec):
    # PyTorch SMPLX convention: norm of (rvec + 1e-8)
    angle = jnp.linalg.norm(rvec + 1e-8, axis=-1, keepdims=True)
    axis = rvec / angle
    x, y, z = axis[..., 0], axis[..., 1], axis[..., 2]
    zeros = jnp.zeros_like(x)
    K = jnp.stack([zeros, -z, y, z, zeros, -x, -y, x, zeros], axis=-1)
    K = K.reshape(rvec.shape[:-1] + (3, 3))
    s = jnp.sin(angle)[..., None]
    c = jnp.cos(angle)[..., None]
    return jnp.eye(3, dtype=rvec.dtype) + s * K + (1.0 - c) * jnp.matmul(K, K)


def make_params(key):
    ks = jax.random.split(key, 12)
    params = {
        'v_template': jax.random.normal(ks[0], (NUM_VERTS, 3), F32) * 0.5,
        'shapedirs': jax.random.normal(ks[1], (NUM_VERTS, 3, N_BETAS), F32) * 0.01,
        'posedirs': jax.random.normal(ks[2], (NUM_POSE_BASIS, NUM_VERTS * 3), F32) * 0.01,
        'J_regressor': jax.nn.softmax(jax.random.normal(ks[3], (NUM_JOINTS, NUM_VERTS), F32), axis=-1),
        'lbs_weights': jax.nn.softmax(jax.random.normal(ks[4], (NUM_VERTS, NUM_JOINTS), F32) * 2.0, axis=-1),
        'faces': jax.random.randint(ks[5], (NUM_FACES, 3), 0, NUM_VERTS, dtype=jnp.int32),
        'lmk_faces_idx': jax.random.randint(ks[6], (NUM_STATIC_LMK,), 0, NUM_FACES, dtype=jnp.int32),
        'lmk_bary_coords': jax.nn.softmax(jax.random.normal(ks[7], (NUM_STATIC_LMK, 3), F32), axis=-1),
        'dynamic_lmk_faces_idx': jax.random.randint(ks[8], (NUM_DYN_BINS, NUM_DYN_LMK), 0, NUM_FACES, dtype=jnp.int32),
        'dynamic_lmk_bary_coords': jax.nn.softmax(jax.random.normal(ks[9], (NUM_DYN_BINS, NUM_DYN_LMK, 3), F32), axis=-1),
        'extra_joint_regressor': jax.nn.softmax(jax.random.normal(ks[10], (NUM_J14, NUM_VERTS), F32), axis=-1),
        'transl': jnp.zeros((1, 3), F32),
    }
    return params
# TODO(synk): extra_joint_selector (JointsFromVerticesSelector) needs an external yaml file; omitted (matches config.extra_joint_path falsy).


if __name__ == "__main__":
    root = jax.random.PRNGKey(0)
    kp, ki = jax.random.split(root)
    params = make_params(kp)
    prep = prepare_smplx_params(params)        # one-time weight re-layouts

    k1, k2, k3 = jax.random.split(ki, 3)
    shape_params = jax.random.normal(k1, (BATCH, N_SHAPE), F32) * 0.3
    expression_params = jax.random.normal(k2, (BATCH, N_EXP), F32) * 0.3
    rvecs = jax.random.normal(k3, (BATCH, NUM_JOINTS, 3), F32) * 0.3
    full_pose = batch_rodrigues(rvecs)                         # (B, 55, 3, 3)

    fwd = jax.jit(smplx_forward)
    vertices, landmarks, joints = fwd(prep, shape_params, expression_params, full_pose)
    jax.block_until_ready((vertices, landmarks, joints))

    assert vertices.shape == (BATCH, NUM_VERTS, 3)
    assert landmarks.shape == (BATCH, NUM_STATIC_LMK + NUM_DYN_LMK, 3)
    assert joints.shape == (BATCH, NUM_JOINTS + NUM_STATIC_LMK + NUM_DYN_LMK, 3)

    # correctness vs pure-JAX f32 reference of the same math (bf16 bases -> ~1e-3 err)
    rv, rl, rj = jax.jit(smplx_forward_reference)(params, shape_params, expression_params, full_pose)
    np.testing.assert_allclose(np.asarray(vertices), np.asarray(rv), rtol=1e-2, atol=1e-2)
    np.testing.assert_allclose(np.asarray(landmarks), np.asarray(rl), rtol=1e-2, atol=1e-2)
    np.testing.assert_allclose(np.asarray(joints), np.asarray(rj), rtol=1e-2, atol=1e-2)

    print("KERNEL_OK")
</pallas_src>

<mosaic_0001>
module attributes {stable_mosaic.version = 11 : i64} {
  func.func @_smplx_fused_kernel(%arg0: i32, %arg1: memref<2x506xbf16, #tpu.memory_space<vmem>>, %arg2: memref<1x506x768xbf16, #tpu.memory_space<vmem>>, %arg3: memref<1x1x768xf32, #tpu.memory_space<vmem>>, %arg4: memref<24x55xf32, #tpu.memory_space<vmem>>, %arg5: memref<55x256xf32, #tpu.memory_space<vmem>>, %arg6: memref<256x14xf32, #tpu.memory_space<vmem>>, %arg7: memref<6x256xf32, #tpu.memory_space<vmem>>, %arg8: memref<6x14xf32, #tpu.memory_space<vmem>>) attributes {dimension_semantics = [#tpu.dimension_semantics<arbitrary>], iteration_bounds = array<i64: 2>, scalar_prefetch = 0 : i64, scratch_operands = 0 : i64, tpu.core_type = #tpu.core_type<tc>, window_params = [{pipeline_mode = #tpu.pipeline_mode<synchronous>, transform_indices = @transform_0, window_bounds = array<i64: 2, 506>}, {transform_indices = @transform_1, window_bounds = array<i64: 1, 506, 768>}, {transform_indices = @transform_2, window_bounds = array<i64: 1, 1, 768>}, {pipeline_mode = #tpu.pipeline_mode<synchronous>, transform_indices = @transform_3, window_bounds = array<i64: 24, 55>}, {transform_indices = @transform_4, window_bounds = array<i64: 55, 256>}, {transform_indices = @transform_5, window_bounds = array<i64: 256, 14>}, {transform_indices = @transform_6, window_bounds = array<i64: 6, 256>}, {pipeline_mode = #tpu.pipeline_mode<synchronous>, transform_indices = @transform_7, window_bounds = array<i64: 6, 14>}]} {
    %c0 = arith.constant 0 : index
    %c0_0 = arith.constant 0 : index
    %c0_1 = arith.constant 0 : index
    %0 = vector.load %arg3[%c0, %c0_0, %c0_1] : memref<1x1x768xf32, #tpu.memory_space<vmem>>, vector<1x1x768xf32>
    %1 = vector.shape_cast %0 : vector<1x1x768xf32> to vector<1x768xf32>
    %c0_2 = arith.constant 0 : index
    %c0_3 = arith.constant 0 : index
    %2 = vector.load %arg1[%c0_2, %c0_3] : memref<2x506xbf16, #tpu.memory_space<vmem>>, vector<2x506xbf16>
    %c0_4 = arith.constant 0 : index
    %c0_5 = arith.constant 0 : index
    %c0_6 = arith.constant 0 : index
    %3 = vector.load %arg2[%c0_4, %c0_5, %c0_6] : memref<1x506x768xbf16, #tpu.memory_space<vmem>>, vector<1x506x768xbf16>
    %4 = vector.shape_cast %3 : vector<1x506x768xbf16> to vector<506x768xbf16>
    %cst = arith.constant dense<0.000000e+00> : vector<2x768xf32>
    %5 = tpu.matmul %2, %4, %cst {dimension_numbers = #tpu.dot_dimension_numbers<[1], [0], [0], [1], [0, 0, 1, 1], [], []>} : vector<2x506xbf16>, vector<506x768xbf16>, vector<2x768xf32> -> vector<2x768xf32>
    %6 = vector.broadcast %1 : vector<1x768xf32> to vector<2x768xf32>
    %7 = arith.addf %6, %5 : vector<2x768xf32>
    %c0_7 = arith.constant 0 : index
    %c0_8 = arith.constant 0 : index
    %8 = vector.load %arg4[%c0_7, %c0_8] : memref<24x55xf32, #tpu.memory_space<vmem>>, vector<24x55xf32>
    %c0_9 = arith.constant 0 : index
    %c0_10 = arith.constant 0 : index
    %9 = vector.load %arg5[%c0_9, %c0_10] : memref<55x256xf32, #tpu.memory_space<vmem>>, vector<55x256xf32>
    %cst_11 = arith.constant dense<0.000000e+00> : vector<24x256xf32>
    %10 = tpu.matmul %8, %9, %cst_11 {dimension_numbers = #tpu.dot_dimension_numbers<[1], [0], [0], [1], [0, 0, 1, 1], [], []>} : vector<24x55xf32>, vector<55x256xf32>, vector<24x256xf32> -> vector<24x256xf32>
    %11 = vector.extract_strided_slice %10 {offsets = [0, 0], sizes = [6, 256], strides = [1, 1]} : vector<24x256xf32> to vector<6x256xf32>
    %12 = vector.extract_strided_slice %10 {offsets = [6, 0], sizes = [6, 256], strides = [1, 1]} : vector<24x256xf32> to vector<6x256xf32>
    %13 = vector.extract_strided_slice %10 {offsets = [12, 0], sizes = [6, 256], strides = [1, 1]} : vector<24x256xf32> to vector<6x256xf32>
    %14 = vector.extract_strided_slice %10 {offsets = [18, 0], sizes = [6, 256], strides = [1, 1]} : vector<24x256xf32> to vector<6x256xf32>
    %15 = vector.extract_strided_slice %7 {offsets = [0, 0], sizes = [2, 256], strides = [1, 1]} : vector<2x768xf32> to vector<2x256xf32>
    %16 = vector.extract_strided_slice %7 {offsets = [0, 256], sizes = [2, 256], strides = [1, 1]} : vector<2x768xf32> to vector<2x256xf32>
    %17 = vector.extract_strided_slice %7 {offsets = [0, 512], sizes = [2, 256], strides = [1, 1]} : vector<2x768xf32> to vector<2x256xf32>
    %18 = tpu.concatenate %15, %15, %15 in 0 : vector<2x256xf32>, vector<2x256xf32>, vector<2x256xf32> -> vector<6x256xf32>
    %19 = tpu.concatenate %16, %16, %16 in 0 : vector<2x256xf32>, vector<2x256xf32>, vector<2x256xf32> -> vector<6x256xf32>
    %20 = tpu.concatenate %17, %17, %17 in 0 : vector<2x256xf32>, vector<2x256xf32>, vector<2x256xf32> -> vector<6x256xf32>
    %21 = arith.mulf %11, %18 : vector<6x256xf32>
    %22 = arith.mulf %12, %19 : vector<6x256xf32>
    %23 = arith.addf %21, %22 : vector<6x256xf32>
    %24 = arith.mulf %13, %20 : vector<6x256xf32>
    %25 = arith.addf %23, %24 : vector<6x256xf32>
    %26 = arith.addf %25, %14 : vector<6x256xf32>
    %c0_12 = arith.constant 0 : index
    %c0_13 = arith.constant 0 : index
    %27 = vector.load %arg7[%c0_12, %c0_13] : memref<6x256xf32, #tpu.memory_space<vmem>>, vector<6x256xf32>
    tpu.vector_store %arg7[%c0_12, %c0_13], %26 {strides = array<i32>} : memref<6x256xf32, #tpu.memory_space<vmem>>, vector<6x256xf32>,
    %c0_i32 = arith.constant 0 : i32
    %28 = arith.cmpi eq, %arg0, %c0_i32 : i32
    %29 = arith.extui %28 : i1 to i32
    %c0_i32_14 = arith.constant 0 : i32
    %30 = arith.cmpi ne, %29, %c0_i32_14 : i32
    scf.if %30 {
      %cst_22 = arith.constant 0.000000e+00 : f32
      %36 = vector.broadcast %cst_22 : f32 to vector<6x14xf32>
      %c0_23 = arith.constant 0 : index
      %c0_24 = arith.constant 0 : index
      %37 = vector.load %arg8[%c0_23, %c0_24] : memref<6x14xf32, #tpu.memory_space<vmem>>, vector<6x14xf32>
      tpu.vector_store %arg8[%c0_23, %c0_24], %36 {strides = array<i32>} : memref<6x14xf32, #tpu.memory_space<vmem>>, vector<6x14xf32>,
    } else {
    }
    %c0_15 = arith.constant 0 : index
    %c0_16 = arith.constant 0 : index
    %31 = vector.load %arg8[%c0_15, %c0_16] : memref<6x14xf32, #tpu.memory_space<vmem>>, vector<6x14xf32>
    %c0_17 = arith.constant 0 : index
    %c0_18 = arith.constant 0 : index
    %32 = vector.load %arg6[%c0_17, %c0_18] : memref<256x14xf32, #tpu.memory_space<vmem>>, vector<256x14xf32>
    %cst_19 = arith.constant dense<0.000000e+00> : vector<6x14xf32>
    %33 = tpu.matmul %26, %32, %cst_19 {dimension_numbers = #tpu.dot_dimension_numbers<[1], [0], [0], [1], [0, 0, 1, 1], [], []>} : vector<6x256xf32>, vector<256x14xf32>, vector<6x14xf32> -> vector<6x14xf32>
    %34 = arith.addf %31, %33 : vector<6x14xf32>
    %c0_20 = arith.constant 0 : index
    %c0_21 = arith.constant 0 : index
    %35 = vector.load %arg8[%c0_20, %c0_21] : memref<6x14xf32, #tpu.memory_space<vmem>>, vector<6x14xf32>
    tpu.vector_store %arg8[%c0_20, %c0_21], %34 {strides = array<i32>} : memref<6x14xf32, #tpu.memory_space<vmem>>, vector<6x14xf32>,
    return
  }
  func.func @transform_0(%arg0: i32) -> (i32, i32) {
    %c0_i32 = arith.constant 0 : i32
    %c0_i32_0 = arith.constant 0 : i32
    %c0_i32_1 = arith.constant 0 : i32
    return %c0_i32, %c0_i32_0 : i32, i32
  }
  func.func @transform_1(%arg0: i32) -> (i32, i32, i32) {
    %c0_i32 = arith.constant 0 : i32
    %c0_i32_0 = arith.constant 0 : i32
    %c0_i32_1 = arith.constant 0 : i32
    return %arg0, %c0_i32, %c0_i32_0 : i32, i32, i32
  }
  func.func @transform_2(%arg0: i32) -> (i32, i32, i32) {
    %c0_i32 = arith.constant 0 : i32
    %c0_i32_0 = arith.constant 0 : i32
    %c0_i32_1 = arith.constant 0 : i32
    return %arg0, %c0_i32, %c0_i32_0 : i32, i32, i32
  }
  func.func @transform_3(%arg0: i32) -> (i32, i32) {
    %c0_i32 = arith.constant 0 : i32
    %c0_i32_0 = arith.constant 0 : i32
    %c0_i32_1 = arith.constant 0 : i32
    return %c0_i32, %c0_i32_0 : i32, i32
  }
  func.func @transform_4(%arg0: i32) -> (i32, i32) {
    %c0_i32 = arith.constant 0 : i32
    %c0_i32_0 = arith.constant 0 : i32
    return %c0_i32, %arg0 : i32, i32
  }
  func.func @transform_5(%arg0: i32) -> (i32, i32) {
    %c0_i32 = arith.constant 0 : i32
    %c0_i32_0 = arith.constant 0 : i32
    return %arg0, %c0_i32 : i32, i32
  }
  func.func @transform_6(%arg0: i32) -> (i32, i32) {
    %c0_i32 = arith.constant 0 : i32
    %c0_i32_0 = arith.constant 0 : i32
    return %c0_i32, %arg0 : i32, i32
  }
  func.func @transform_7(%arg0: i32) -> (i32, i32) {
    %c0_i32 = arith.constant 0 : i32
    %c0_i32_0 = arith.constant 0 : i32
    %c0_i32_1 = arith.constant 0 : i32
    return %c0_i32, %c0_i32_0 : i32, i32
  }
}

</mosaic_0001>

<bundles_post_ra>
// kernel: smplx_forward.1
= control target key start
LH: loop header
LB: loop body
LE: loop exit
PB: predicated region body
PF: predicated region fallthrough
CT: control target
= control target key end

     0   :  { %s3358_s24 = smov 0   ;;  %s3360_s25 = smov 0   ;;  %s3961_s0 = inlined_call_operand.vmem [shape: bf16[2,506], index: 0, kind: input, shape index: {}]   ;;  %s3962_s1 = inlined_call_operand.vmem [shape: bf16[2,506,768], index: 1, kind: input, shape index: {}]   ;;  %s3963_s2 = inlined_call_operand.vmem [shape: f32[2,1,768], index: 2, kind: input, shape index: {}]   ;;  %s3964_s3 = inlined_call_operand.vmem [shape: f32[24,55], index: 3, kind: input, shape index: {}]   ;;  %s3965_s4 = inlined_call_operand.vmem [shape: f32[55,512], index: 4, kind: input, shape index: {}]   ;;  %s3966_s5 = inlined_call_operand.vmem [shape: f32[512,14], index: 5, kind: input, shape index: {}]   ;;  %s3967_s6 = inlined_call_operand.vmem [shape: f32[6,512], index: 6, kind: output, shape index: {0}]   ;;  %s3968_s7 = inlined_call_operand.vmem [shape: f32[6,14], index: 7, kind: output, shape index: {1}]  }
   0x1   :  { %s3362_s26 = smov 0  }
   0x2 LB: > { %s3374_s27 = sadd.s32 4294967295, %s3315_s26   ;;  %s3377_s28 = sadd.s32 1, %s3315_s26   ;;  %s3315_s26 = sphi %s3362_s26, %s3971_s26   ;;  %s3311_s25 = sphi %s3360_s25, %s3970_s25   ;;  %s3307_s24 = sphi %s3358_s24, %s3969_s24  }
   0x3   : > { %s116_s29 = ssub.s32 %s3315_s26, %s3377_s28  ;;  %s119_s30 = sadd.s32 1, %s3311_s25 }
   0x4   : > { %p117_p0 = scmp.eq.s32.totalorder %s116_s29, 0  ;;  %p126_p1 = scmp.ne.s32.totalorder %s3311_s25, %s3307_s24 }
   0x5   : > { %p127_p2 = scmp.eq.s32.totalorder %s3315_s26, 0  ;;  %p2273_p4 = scmp.ge.s32.totalorder %s3315_s26, 2 }
   0x6   : > { %s3386_s8 = scalar_select %p117_p0, %s3311_s25, %s119_s30  }
   0x7   : > { %p128_p3 = por %p127_p2, %p126_p1  ;;  %231 = sbr.rel (%p2273_p4) target bundleno = 30 (0x1e), region = 24 }
   0xc   : > { %249 = sbr.rel (!%p128_p3) target bundleno = 30 (0x1e), region = 36  ;;  %s251_s9 = sand.u32 (%p128_p3), 1, %s3311_s25  }
   0xd   : > { %s3067_s10 = sshll.u32 (%p128_p3), %s3315_s26, 4  ;;  %s3260_s11 = smul.u32 (%p128_p3), 112, %s251_s9 }
   0xe   : > { %s256_s14 = scalar_lea.vmem (%p128_p3), %s3965_s4, %s3067_s10 }
   0xf   : > { %v269_v0 = vld [vmem:[%s256_s14] sm:$0xff] (%p128_p3)  ;;  %v271_v1 = vld [vmem:[%s256_s14 + $0x8] sm:$0xff] (%p128_p3)  ;;  %s253_s15 = scalar_lea.vmem (%p128_p3), [#allocation2], %s3260_s11 }
  0x10   : > { %v273_v2 = vld [vmem:[%s256_s14 + $0x20] sm:$0xff] (%p128_p3)  ;;  %270 = vst [vmem:[%s253_s15] sm:$0xff] (%p128_p3), %v269_v0  ;;  %v275_v3 = vld [vmem:[%s256_s14 + $0x28] sm:$0xff] (%p128_p3) }
  0x11   : > { %272 = vst [vmem:[%s253_s15 + $0x8] sm:$0xff] %v271_v1  ;;  %v277_v4 = vld [vmem:[%s256_s14 + $0x40] sm:$0xff]  ;;  %v279_v5 = vld [vmem:[%s256_s14 + $0x48] sm:$0xff] }
  0x12   : > { %274 = vst [vmem:[%s253_s15 + $0x10] sm:$0xff] %v273_v2  ;;  %v281_v6 = vld [vmem:[%s256_s14 + $0x60] sm:$0xff]  ;;  %v283_v7 = vld [vmem:[%s256_s14 + $0x68] sm:$0xff] }
  0x13   : > { %276 = vst [vmem:[%s253_s15 + $0x18] sm:$0xff] %v275_v3  ;;  %v285_v8 = vld [vmem:[%s256_s14 + $0x80] sm:$0xff]  ;;  %v287_v9 = vld [vmem:[%s256_s14 + $0x88] sm:$0xff] }
  0x14   : > { %278 = vst [vmem:[%s253_s15 + $0x20] sm:$0xff] %v277_v4  ;;  %v289_v10 = vld [vmem:[%s256_s14 + $0xa0] sm:$0xff]  ;;  %v291_v11 = vld [vmem:[%s256_s14 + $0xa8] sm:$0xff] }
  0x15   : > { %280 = vst [vmem:[%s253_s15 + $0x28] sm:$0xff] %v279_v5  ;;  %v293_v12 = vld [vmem:[%s256_s14 + $0xc0] sm:$0xff]  ;;  %v295_v13 = vld [vmem:[%s256_s14 + $0xc8] sm:$0xff] }
  0x16   : > { %282 = vst [vmem:[%s253_s15 + $0x30] sm:$0xff] %v281_v6 }
  0x17   : > { %284 = vst [vmem:[%s253_s15 + $0x38] sm:$0xff] %v283_v7 }
  0x18   : > { %286 = vst [vmem:[%s253_s15 + $0x40] sm:$0xff] %v285_v8 }
  0x19   : > { %288 = vst [vmem:[%s253_s15 + $0x48] sm:$0xff] %v287_v9 }
  0x1a   : > { %290 = vst [vmem:[%s253_s15 + $0x50] sm:$0xff] %v289_v10 }
  0x1b   : > { %292 = vst [vmem:[%s253_s15 + $0x58] sm:$0xff] %v291_v11 }
  0x1c   : > { %294 = vst [vmem:[%s253_s15 + $0x60] sm:$0xff] %v293_v12 }
  0x1d   : > { %296 = vst [vmem:[%s253_s15 + $0x68] sm:$0xff] %v295_v13 }
  0x1e PF: > { %p2276_p5 = scmp.ge.s32.totalorder %s3315_s26, 1  ;;  %p310_p6 = scmp.lt.s32.totalorder %s3315_s26, 3 }
  0x20   : > { %p311_p7 = pnand %p2276_p5, %p310_p6 }
  0x21   : > { %p362_p8 = scmp.lt.s32.totalorder (!%p311_p7), %s3374_s27, 1  ;;  %s2278_s16 = sshll.u32 (!%p311_p7), %s3374_s27, 5 }
  0x22   : > { %314 = sbr.rel (%p311_p7) target bundleno = 581 (0x245), region = 63  ;;  %p373_p9 = scmp.lt.s32.totalorder (!%p311_p7), %s2278_s16, 63 }
  0x23   : > { %s317_s10 = sand.u32 (!%p311_p7), 1, %s3307_s24   ;;  %p3064_p11 = scmp.ne.s32.totalorder (!%p311_p7), %s3374_s27, 0 }
  0x24   : > { %s3261_s11 = smul.u32 (!%p311_p7), 112, %s317_s10 }
  0x26   : > { %s3839_s24 = scalar_lea.vmem (!%p311_p7), [#allocation2], %s3261_s11 }
  0x27   : > { %s3399_s17 = scalar_select %p362_p8, %s3374_s27, 1  ;;  %vm1544_vm0 = vcmask 1044480   ;;  %vm1541_vm1 = vcmask 998400   ;;  %vm1921_vm2 = vcmask 1046528   ;;  %vm1911_vm3 = vcmask 449536  }
  0x28   : > { %s3973_s16 = smov (!%p373_p9, %s2278_s16), 63  ;;  %vm1990_vm4 = vcmask 1041408   ;;  %vm1993_vm5 = vcmask 1043456  }
  0x29   : > { %s3262_s18 = smul.u32 1536, %s3399_s17  ;;  %s2279_s19 = sshll.u32 %s3973_s16, 3 }
  0x2a   : > { %s3410_s29 = scalar_lea.vmem %s3966_s5, %s2279_s19  ;;  %s3263_s19 = smul.u32 6, %s3399_s17 }
  0x2b   : > { %s3405_s22 = scalar_lea.vmem %s3962_s1, %s3262_s18  ;;  %s2280_s17 = sshll.u32 %s3374_s27, 1 }
  0x2c   : > { %v2452_v14 = vld [vmem:[%s3405_s22 + $0x150] sm:$0xf]  ;;  %v3113_v15 = vld [vmem:[%s3405_s22 + $0x164] sm:$0xf0]  ;;  %v2428_v25 = vld [vmem:[%s3405_s22 + $0x120] sm:$0xf] }
  0x2d   : > { %v2644_v16 = vld [vmem:[%s3405_s22 + $0x2d0] sm:$0xf]  ;;  %v2453_v17 = vor.u32 %v3113_v15, %v2452_v14  ;;  %v3161_v18 = vld [vmem:[%s3405_s22 + $0x2e4] sm:$0xf0]  ;;  %v3107_v27 = vld [vmem:[%s3405_s22 + $0x134] sm:$0xf0] }
  0x2e   : > { %v2836_v19 = vld [vmem:[%s3405_s22 + $0x450] sm:$0xf]  ;;  %v3209_v20 = vld [vmem:[%s3405_s22 + $0x464] sm:$0xf0]  ;;  %v2645_v21 = vor.u32 %v3161_v18, %v2644_v16  ;;  %v2620_v28 = vld [vmem:[%s3405_s22 + $0x2a0] sm:$0xf]  ;;  %v2429_v30 = vor.u32 %v3107_v27, %v2428_v25 }
  0x2f   : > { %v2837_v22 = vor.u32 %v3209_v20, %v2836_v19  ;;  %v3028_v23 = vld [vmem:[%s3405_s22 + $0x5d0] sm:$0xf]  ;;  %v3257_v24 = vld [vmem:[%s3405_s22 + $0x5e4] sm:$0x10]  ;;  %1563 = vmatpush.bf16.msra.mxu0 %v2453_v17  ;;  %v3155_v29 = vld [vmem:[%s3405_s22 + $0x2b4] sm:$0xf0] }
  0x30   : > { %v3029_v26 = vor.u32 %v3257_v24, %v3028_v23  ;;  %1576 = vmatpush.bf16.msra.mxu1 %v2645_v21  ;;  %v2621_v31 = vor.u32 %v3155_v29, %v2620_v28  ;;  %v2812_v32 = vld [vmem:[%s3405_s22 + $0x420] sm:$0xf]  ;;  %v3203_v33 = vld [vmem:[%s3405_s22 + $0x434] sm:$0xf0]  ;;  %v2404_v38 = vld [vmem:[%s3405_s22 + $0xf0] sm:$0xf] }
  0x31   : > { %1589 = vmatpush.bf16.msra.mxu2 %v2837_v22  ;;  %v3004_v34 = vld [vmem:[%s3405_s22 + $0x5a0] sm:$0xf]  ;;  %v2813_v36 = vor.u32 %v3203_v33, %v2812_v32  ;;  %v3251_v37 = vld [vmem:[%s3405_s22 + $0x5b4] sm:$0xf0]  ;;  %v3101_v40 = vld [vmem:[%s3405_s22 + $0x104] sm:$0xf0] }
  0x32   : > { %v1546_v35 = vsel %vm1544_vm0, %v3029_v26, 0  ;;  %v3005_v39 = vor.u32 %v3251_v37, %v3004_v34  ;;  %v2596_v41 = vld [vmem:[%s3405_s22 + $0x270] sm:$0xf]  ;;  %v3149_v42 = vld [vmem:[%s3405_s22 + $0x284] sm:$0xf0]  ;;  %v2405_v43 = vor.u32 %v3101_v40, %v2404_v38  ;;  %p379_p10 = scmp.lt.s32.totalorder %s2280_s17, 3 }
  0x33   : > { %1602 = vmatpush.bf16.msra.mxu3 %v1546_v35  ;;  %1564 = vmatpush.bf16.msra.mxu0 %v2429_v30  ;;  %v2788_v44 = vld [vmem:[%s3405_s22 + $0x3f0] sm:$0xf]  ;;  %v3197_v45 = vld [vmem:[%s3405_s22 + $0x404] sm:$0xf0]  ;;  %v2597_v47 = vor.u32 %v3149_v42, %v2596_v41  ;;  %v2380_v50 = vld [vmem:[%s3405_s22 + $0xc0] sm:$0xf] }
  0x34   : > { %v2980_v46 = vld [vmem:[%s3405_s22 + $0x570] sm:$0xf]  ;;  %1577 = vmatpush.bf16.msra.mxu1 %v2621_v31  ;;  %v2789_v48 = vor.u32 %v3197_v45, %v2788_v44  ;;  %v3245_v49 = vld [vmem:[%s3405_s22 + $0x584] sm:$0xf0]  ;;  %v3095_v51 = vld [vmem:[%s3405_s22 + $0xd4] sm:$0xf0] }
  0x35   : > { %1590 = vmatpush.bf16.msra.mxu2 %v2813_v36  ;;  %v2572_v52 = vld [vmem:[%s3405_s22 + $0x240] sm:$0xf]  ;;  %v3143_v53 = vld [vmem:[%s3405_s22 + $0x254] sm:$0xf0]  ;;  %v2981_v55 = vor.u32 %v3245_v49, %v2980_v46  ;;  %v2381_v57 = vor.u32 %v3095_v51, %v2380_v50  ;;  %v2356_v62 = vld [vmem:[%s3405_s22 + $0x90] sm:$0xf] }
  0x36   : > { %v2764_v54 = vld [vmem:[%s3405_s22 + $0x3c0] sm:$0xf]  ;;  %v3191_v56 = vld [vmem:[%s3405_s22 + $0x3d4] sm:$0xf0]  ;;  %v2573_v60 = vor.u32 %v3143_v53, %v2572_v52  ;;  %v3089_v63 = vld [vmem:[%s3405_s22 + $0xa4] sm:$0xf0] }
  0x37   : > { %1603 = vmatpush.bf16.msra.mxu3 %v3005_v39  ;;  %1565 = vmatpush.bf16.msra.mxu0 %v2405_v43  ;;  %v2956_v58 = vld [vmem:[%s3405_s22 + $0x540] sm:$0xf]  ;;  %v3239_v59 = vld [vmem:[%s3405_s22 + $0x554] sm:$0xf0]  ;;  %v2765_v61 = vor.u32 %v3191_v56, %v2764_v54  ;;  %v2548_v0 = vld [vmem:[%s3405_s22 + $0x210] sm:$0xf]  ;;  %v2357_v5 = vor.u32 %v3089_v63, %v2356_v62 }
  0x38   : > { %1578 = vmatpush.bf16.msra.mxu1 %v2597_v47  ;;  %v3137_v1 = vld [vmem:[%s3405_s22 + $0x224] sm:$0xf0]  ;;  %v2740_v2 = vld [vmem:[%s3405_s22 + $0x390] sm:$0xf]  ;;  %v2957_v4 = vor.u32 %v3239_v59, %v2956_v58  ;;  %v2332_v10 = vld [vmem:[%s3405_s22 + $0x60] sm:$0xf] }
  0x39   : > { %1591 = vmatpush.bf16.msra.mxu2 %v2789_v48  ;;  %v3185_v3 = vld [vmem:[%s3405_s22 + $0x3a4] sm:$0xf0]  ;;  %v2932_v6 = vld [vmem:[%s3405_s22 + $0x510] sm:$0xf]  ;;  %v2549_v8 = vor.u32 %v3137_v1, %v2548_v0  ;;  %v3083_v11 = vld [vmem:[%s3405_s22 + $0x74] sm:$0xf0] }
  0x3a   : > { %v3233_v7 = vld [vmem:[%s3405_s22 + $0x524] sm:$0xf0]  ;;  %v2741_v9 = vor.u32 %v3185_v3, %v2740_v2  ;;  %v2524_v12 = vld [vmem:[%s3405_s22 + $0x1e0] sm:$0xf]  ;;  %v3131_v13 = vld [vmem:[%s3405_s22 + $0x1f4] sm:$0xf0]  ;;  %v2333_v17 = vor.u32 %v3083_v11, %v2332_v10 }
  0x3b   : > { %1604 = vmatpush.bf16.msra.mxu3 %v2981_v55  ;;  %1566 = vmatpush.bf16.msra.mxu0 %v2381_v57  ;;  %v2716_v14 = vld [vmem:[%s3405_s22 + $0x360] sm:$0xf]  ;;  %v3179_v15 = vld [vmem:[%s3405_s22 + $0x374] sm:$0xf0]  ;;  %v2933_v16 = vor.u32 %v3233_v7, %v2932_v6  ;;  %v2525_v20 = vor.u32 %v3131_v13, %v2524_v12  ;;  %v2308_v22 = vld [vmem:[%s3405_s22 + $0x30] sm:$0xf] }
  0x3c   : > { %1579 = vmatpush.bf16.msra.mxu1 %v2573_v60  ;;  %v2908_v18 = vld [vmem:[%s3405_s22 + $0x4e0] sm:$0xf]  ;;  %v3227_v19 = vld [vmem:[%s3405_s22 + $0x4f4] sm:$0xf0]  ;;  %v2717_v21 = vor.u32 %v3179_v15, %v2716_v14  ;;  %v3077_v23 = vld [vmem:[%s3405_s22 + $0x44] sm:$0xf0] }
  0x3d   : > { %1592 = vmatpush.bf16.msra.mxu2 %v2765_v61  ;;  %v2500_v24 = vld [vmem:[%s3405_s22 + $0x1b0] sm:$0xf]  ;;  %v3125_v25 = vld [vmem:[%s3405_s22 + $0x1c4] sm:$0xf0]  ;;  %v2909_v28 = vor.u32 %v3227_v19, %v2908_v18  ;;  %v2284_v31 = vld [vmem:[%s3405_s22] sm:$0xf]  ;;  %v2309_v32 = vor.u32 %v3077_v23, %v2308_v22 }
  0x3e   : > { %v2692_v26 = vld [vmem:[%s3405_s22 + $0x330] sm:$0xf]  ;;  %v3173_v27 = vld [vmem:[%s3405_s22 + $0x344] sm:$0xf0]  ;;  %v3071_v33 = vld [vmem:[%s3405_s22 + $0x14] sm:$0xf0]  ;;  %v2501_v36 = vor.u32 %v3125_v25, %v2500_v24 }
  0x3f   : > { %1605 = vmatpush.bf16.msra.mxu3 %v2957_v4  ;;  %1567 = vmatpush.bf16.msra.mxu0 %v2357_v5  ;;  %v2884_v29 = vld [vmem:[%s3405_s22 + $0x4b0] sm:$0xf]  ;;  %v3221_v30 = vld [vmem:[%s3405_s22 + $0x4c4] sm:$0xf0]  ;;  %v2476_v34 = vld [vmem:[%s3405_s22 + $0x180] sm:$0xf]  ;;  %v2693_v37 = vor.u32 %v3173_v27, %v2692_v26  ;;  %v2285_v48 = vor.u32 %v3071_v33, %v2284_v31 }
  0x40   : > { %1580 = vmatpush.bf16.msra.mxu1 %v2549_v8  ;;  %v3119_v35 = vld [vmem:[%s3405_s22 + $0x194] sm:$0xf0]  ;;  %v2668_v38 = vld [vmem:[%s3405_s22 + $0x300] sm:$0xf]  ;;  %v3110_v40 = vld [vmem:[%s3405_s22 + $0x154] sm:$0xf]  ;;  %v2885_v44 = vor.u32 %v3221_v30, %v2884_v29 }
  0x41   : > { %1593 = vmatpush.bf16.msra.mxu2 %v2741_v9  ;;  %v3167_v39 = vld [vmem:[%s3405_s22 + $0x314] sm:$0xf0]  ;;  %v2454_v41 = vld [vmem:[%s3405_s22 + $0x168] sm:$0xf0]  ;;  %v3254_v42 = vld [vmem:[%s3405_s22 + $0x5d4] sm:$0xf]  ;;  %v2477_v52 = vor.u32 %v3119_v35, %v2476_v34 }
  0x42   : > { %v3030_v43 = vld [vmem:[%s3405_s22 + $0x5e8] sm:$0x10]  ;;  %v3158_v45 = vld [vmem:[%s3405_s22 + $0x2d4] sm:$0xf]  ;;  %v2860_v50 = vld [vmem:[%s3405_s22 + $0x480] sm:$0xf]  ;;  %v2669_v53 = vor.u32 %v3167_v39, %v2668_v38  ;;  %v2457_v55 = vor.u32 %v3110_v40, %v2454_v41 }
  0x43   : > { %1606 = vmatpush.bf16.msra.mxu3 %v2933_v16  ;;  %1568 = vmatpush.bf16.msra.mxu0 %v2333_v17  ;;  %v2646_v46 = vld [vmem:[%s3405_s22 + $0x2e8] sm:$0xf0]  ;;  %v3206_v47 = vld [vmem:[%s3405_s22 + $0x454] sm:$0xf]  ;;  %v3215_v51 = vld [vmem:[%s3405_s22 + $0x494] sm:$0xf0]  ;;  %v3033_v54 = vor.u32 %v3254_v42, %v3030_v43 }
  0x44   : > { %1581 = vmatpush.bf16.msra.mxu1 %v2525_v20  ;;  %v2838_v49 = vld [vmem:[%s3405_s22 + $0x468] sm:$0xf0]  ;;  %v2649_v56 = vor.u32 %v3158_v45, %v2646_v46  ;;  %v3104_v57 = vld [vmem:[%s3405_s22 + $0x124] sm:$0xf]  ;;  %v2861_v59 = vor.u32 %v3215_v51, %v2860_v50  ;;  %v2430_v60 = vld [vmem:[%s3405_s22 + $0x138] sm:$0xf0] }
  0x45   : > { %1594 = vmatpush.bf16.msra.mxu2 %v2717_v21  ;;  %v2841_v58 = vor.u32 %v3206_v47, %v2838_v49  ;;  %v3152_v61 = vld [vmem:[%s3405_s22 + $0x2a4] sm:$0xf]  ;;  %v2622_v62 = vld [vmem:[%s3405_s22 + $0x2b8] sm:$0xf0]  ;;  %v1549_v1 = vsel %vm1544_vm0, %v3033_v54, 0  ;;  %v2433_v4 = vor.u32 %v3104_v57, %v2430_v60  ;;  %s3975_s17 = smov (!%p379_p10, %s2280_s17), 3 }
  0x46   : > { %v3200_v63 = vld [vmem:[%s3405_s22 + $0x424] sm:$0xf]  ;;  %v2814_v0 = vld [vmem:[%s3405_s22 + $0x438] sm:$0xf0]  ;;  %v2625_v5 = vor.u32 %v3152_v61, %v2622_v62  ;;  %v3098_v6 = vld [vmem:[%s3405_s22 + $0xf4] sm:$0xf] }
  0x47   : > { %1607 = vmatpush.bf16.msra.mxu3 %v2909_v28  ;;  %1569 = vmatpush.bf16.msra.mxu0 %v2309_v32  ;;  %v3248_v2 = vld [vmem:[%s3405_s22 + $0x5a4] sm:$0xf]  ;;  %v3006_v3 = vld [vmem:[%s3405_s22 + $0x5b8] sm:$0xf0]  ;;  %v2817_v7 = vor.u32 %v3200_v63, %v2814_v0  ;;  %v2406_v8 = vld [vmem:[%s3405_s22 + $0x108] sm:$0xf0] }
  0x48   : > { %1582 = vmatpush.bf16.msra.mxu1 %v2501_v36  ;;  %v3146_v9 = vld [vmem:[%s3405_s22 + $0x274] sm:$0xf]  ;;  %v2598_v10 = vld [vmem:[%s3405_s22 + $0x288] sm:$0xf0]  ;;  %v3009_v11 = vor.u32 %v3248_v2, %v3006_v3  ;;  %v2409_v16 = vor.u32 %v3098_v6, %v2406_v8  ;;  %v3092_v18 = vld [vmem:[%s3405_s22 + $0xc4] sm:$0xf] }
  0x49   : > { %1595 = vmatpush.bf16.msra.mxu2 %v2693_v37  ;;  %v3194_v12 = vld [vmem:[%s3405_s22 + $0x3f4] sm:$0xf]  ;;  %v2790_v13 = vld [vmem:[%s3405_s22 + $0x408] sm:$0xf0]  ;;  %v2601_v17 = vor.u32 %v3146_v9, %v2598_v10  ;;  %v2382_v19 = vld [vmem:[%s3405_s22 + $0xd8] sm:$0xf0] }
  0x4a   : > { %v3242_v14 = vld [vmem:[%s3405_s22 + $0x574] sm:$0xf]  ;;  %v2982_v15 = vld [vmem:[%s3405_s22 + $0x588] sm:$0xf0]  ;;  %v385_v20 = vld [vmem:[%s3961_s0] sm:$0xf]  ;;  %v2793_v21 = vor.u32 %v3194_v12, %v2790_v13  ;;  %v2385_v29 = vor.u32 %v3092_v18, %v2382_v19 }
  0x4b   : > { %1608 = vmatpush.bf16.msra.mxu3 %v2885_v44  ;;  %1570 = vmatpush.bf16.msra.mxu0 %v2285_v48  ;;  %v3140_v22 = vld [vmem:[%s3405_s22 + $0x244] sm:$0xf]  ;;  %v2574_v23 = vld [vmem:[%s3405_s22 + $0x258] sm:$0xf0]  ;;  %579 = vst [vmem:[#allocation1] ss:$9 sm:$0xff] %v385_v20  ;;  %v2985_v24 = vor.u32 %v3242_v14, %v2982_v15 }
  0x4c   : > { %1583 = vmatpush.bf16.msra.mxu1 %v2477_v52  ;;  %v3188_v25 = vld [vmem:[%s3405_s22 + $0x3c4] sm:$0xf]  ;;  %v2766_v26 = vld [vmem:[%s3405_s22 + $0x3d8] sm:$0xf0]  ;;  %v2577_v30 = vor.u32 %v3140_v22, %v2574_v23  ;;  %v3086_v31 = vld [vmem:[%s3405_s22 + $0x94] sm:$0xf] }
  0x4d   : > { %1596 = vmatpush.bf16.msra.mxu2 %v2669_v53  ;;  %v3236_v27 = vld [vmem:[%s3405_s22 + $0x544] sm:$0xf]  ;;  %v2958_v28 = vld [vmem:[%s3405_s22 + $0x558] sm:$0xf0]  ;;  %v2769_v32 = vor.u32 %v3188_v25, %v2766_v26  ;;  %v2358_v33 = vld [vmem:[%s3405_s22 + $0xa8] sm:$0xf0] }
  0x4e   : > { %v3134_v34 = vld [vmem:[%s3405_s22 + $0x214] sm:$0xf]  ;;  %v2550_v35 = vld [vmem:[%s3405_s22 + $0x228] sm:$0xf0]  ;;  %v2961_v36 = vor.u32 %v3236_v27, %v2958_v28  ;;  %v3080_v41 = vld [vmem:[%s3405_s22 + $0x64] sm:$0xf]  ;;  %v2361_v43 = vor.u32 %v3086_v31, %v2358_v33 }
  0x4f   : > { %1615 = vmatpush.bf16.msrb.mxu0 %v2457_v55  ;;  %1609 = vmatpush.bf16.msra.mxu3 %v2861_v59  ;;  %v3182_v37 = vld [vmem:[%s3405_s22 + $0x394] sm:$0xf]  ;;  %v2742_v38 = vld [vmem:[%s3405_s22 + $0x3a8] sm:$0xf0]  ;;  %v2334_v42 = vld [vmem:[%s3405_s22 + $0x78] sm:$0xf0]  ;;  %v2553_v44 = vor.u32 %v3134_v34, %v2550_v35 }
  0x50   : > { %1628 = vmatpush.bf16.msrb.mxu1 %v2649_v56  ;;  %v3230_v39 = vld [vmem:[%s3405_s22 + $0x514] sm:$0xf]  ;;  %v2934_v40 = vld [vmem:[%s3405_s22 + $0x528] sm:$0xf0]  ;;  %v2745_v48 = vor.u32 %v3182_v37, %v2742_v38  ;;  %v3128_v49 = vld [vmem:[%s3405_s22 + $0x1e4] sm:$0xf]  ;;  %v2337_v57 = vor.u32 %v3080_v41, %v2334_v42 }
  0x51   : > { %1641 = vmatpush.bf16.msrb.mxu2 %v2841_v58  ;;  %v2526_v50 = vld [vmem:[%s3405_s22 + $0x1f8] sm:$0xf0]  ;;  %v2937_v52 = vor.u32 %v3230_v39, %v2934_v40  ;;  %v3176_v53 = vld [vmem:[%s3405_s22 + $0x364] sm:$0xf]  ;;  %v3074_v59 = vld [vmem:[%s3405_s22 + $0x34] sm:$0xf] }
  0x52   : > { %v3523_v45 = vld [vmem:[#allocation1] sm:$0xff]  ;;  %v3525_v46 = vld [vmem:[#allocation1 + $0x9] sm:$0xff]  ;;  %v3527_v47 = vld [vmem:[#allocation1 + $0x12] sm:$0xff]  ;;  %v2529_v58 = vor.u32 %v3128_v49, %v2526_v50  ;;  %s2281_s23 = sshll.u32 %s3975_s17, 3 }
  0x53   : > { %1654 = vmatpush.bf16.msrb.mxu3 %v1549_v1  ;;  %1616 = vmatpush.bf16.msrb.mxu0 %v2433_v4  ;;  %v3532_v51 = vld [vmem:[#allocation1 + $0x1b] sm:$0xff]  ;;  %v3224_v55 = vld [vmem:[%s3405_s22 + $0x4e4] sm:$0xf]  ;;  %v2310_v61 = vld [vmem:[%s3405_s22 + $0x48] sm:$0xf0]  ;;  %s382_s9 = scalar_lea.vmem %s3967_s6, %s2281_s23 }
  0x54   : > { %1629 = vmatpush.bf16.msrb.mxu1 %v2625_v5  ;;  %1571 = vmatmul.bf16.vlgmr.msra.gmra.mxu0 %v3523_v45  ;;  %v2718_v54 = vld [vmem:[%s3405_s22 + $0x378] sm:$0xf0]  ;;  %v3122_v62 = vld [vmem:[%s3405_s22 + $0x1b4] sm:$0xf]  ;;  %v2502_v63 = vld [vmem:[%s3405_s22 + $0x1c8] sm:$0xf0] }
  0x55   : > { %1642 = vmatpush.bf16.msrb.mxu2 %v2817_v7  ;;  %1584 = vmatmul.bf16.vlgmr.msra.gmra.mxu1 %v3525_v46  ;;  %v2910_v56 = vld [vmem:[%s3405_s22 + $0x4f8] sm:$0xf0]  ;;  %v2721_v60 = vor.u32 %v3176_v53, %v2718_v54  ;;  %v3170_v1 = vld [vmem:[%s3405_s22 + $0x334] sm:$0xf]  ;;  %v2694_v2 = vld [vmem:[%s3405_s22 + $0x348] sm:$0xf0]  ;;  %v2313_v7 = vor.u32 %v3074_v59, %v2310_v61  ;;  %v2505_v8 = vor.u32 %v3122_v62, %v2502_v63 }
  0x56   : > { %1597 = vmatmul.bf16.vlgmr.msra.gmra.mxu2 %v3527_v47  ;;  %3050 = vmatmul.msk.bf16.vlgmr.msra.gmra.mxu3 %vm1541_vm1, %v3532_v51  ;;  %v2913_v0 = vor.u32 %v3224_v55, %v2910_v56  ;;  %v3218_v3 = vld [vmem:[%s3405_s22 + $0x4b4] sm:$0xf]  ;;  %v2886_v4 = vld [vmem:[%s3405_s22 + $0x4c8] sm:$0xf0]  ;;  %v3068_v5 = vld [vmem:[%s3405_s22 + $0x4] sm:$0xf]  ;;  %v2697_v12 = vor.u32 %v3170_v1, %v2694_v2 }
  0x57   : > { %1655 = vmatpush.bf16.msrb.mxu3 %v3009_v11  ;;  %1617 = vmatpush.bf16.msrb.mxu0 %v2409_v16  ;;  %v2286_v6 = vld [vmem:[%s3405_s22 + $0x18] sm:$0xf0]  ;;  %v3116_v9 = vld [vmem:[%s3405_s22 + $0x184] sm:$0xf]  ;;  %v2460_v14 = vld [vmem:[%s3405_s22 + $0x158] sm:$0xf]  ;;  %v2889_v16 = vor.u32 %v3218_v3, %v2886_v4 }
  0x58   : > { %1630 = vmatpush.bf16.msrb.mxu1 %v2601_v17  ;;  %v2478_v10 = vld [vmem:[%s3405_s22 + $0x198] sm:$0xf0]  ;;  %v3164_v11 = vld [vmem:[%s3405_s22 + $0x304] sm:$0xf]  ;;  %v3114_v15 = vld [vmem:[%s3405_s22 + $0x16c] sm:$0xf0]  ;;  %v2289_v23 = vor.u32 %v3068_v5, %v2286_v6 }
  0x59   : > { %1643 = vmatpush.bf16.msrb.mxu2 %v2793_v21  ;;  %v2670_v13 = vld [vmem:[%s3405_s22 + $0x318] sm:$0xf0]  ;;  %v2652_v17 = vld [vmem:[%s3405_s22 + $0x2d8] sm:$0xf]  ;;  %v3258_v19 = vld [vmem:[%s3405_s22 + $0x5ec] sm:$0x10]  ;;  %v2461_v28 = vor.u32 %v3114_v15, %v2460_v14 }
  0x5a   : > { %v3036_v18 = vld [vmem:[%s3405_s22 + $0x5d8] sm:$0xf]  ;;  %v3162_v20 = vld [vmem:[%s3405_s22 + $0x2ec] sm:$0xf0]  ;;  %v3212_v25 = vld [vmem:[%s3405_s22 + $0x484] sm:$0xf]  ;;  %v2673_v27 = vor.u32 %v3164_v11, %v2670_v13 }
  0x5b   : > { %1656 = vmatpush.bf16.msrb.mxu3 %v2985_v24  ;;  %1618 = vmatpush.bf16.msrb.mxu0 %v2385_v29  ;;  %v2844_v21 = vld [vmem:[%s3405_s22 + $0x458] sm:$0xf]  ;;  %v3210_v22 = vld [vmem:[%s3405_s22 + $0x46c] sm:$0xf0]  ;;  %v2481_v24 = vor.u32 %v3116_v9, %v2478_v10  ;;  %v2862_v26 = vld [vmem:[%s3405_s22 + $0x498] sm:$0xf0]  ;;  %v3037_v29 = vor.u32 %v3258_v19, %v3036_v18 }
  0x5c   : > { %1631 = vmatpush.bf16.msrb.mxu1 %v2577_v30  ;;  %v2653_v30 = vor.u32 %v3162_v20, %v2652_v17  ;;  %v2845_v31 = vor.u32 %v3210_v22, %v2844_v21  ;;  %v3108_v33 = vld [vmem:[%s3405_s22 + $0x13c] sm:$0xf0]  ;;  %v2628_v34 = vld [vmem:[%s3405_s22 + $0x2a8] sm:$0xf]  ;;  %v2865_v35 = vor.u32 %v3212_v25, %v2862_v26  ;;  %v3102_v49 = vld [vmem:[%s3405_s22 + $0x10c] sm:$0xf0] }
  0x5d   : > { %1644 = vmatpush.bf16.msrb.mxu2 %v2769_v32  ;;  %v2436_v32 = vld [vmem:[%s3405_s22 + $0x128] sm:$0xf]  ;;  %v3204_v38 = vld [vmem:[%s3405_s22 + $0x43c] sm:$0xf0]  ;;  %v1552_v39 = vsel %vm1544_vm0, %v3037_v29, 0 }
  0x5e   : > { %v2820_v37 = vld [vmem:[%s3405_s22 + $0x428] sm:$0xf]  ;;  %v2437_v40 = vor.u32 %v3108_v33, %v2436_v32  ;;  %v3252_v42 = vld [vmem:[%s3405_s22 + $0x5bc] sm:$0xf0]  ;;  %v2604_v50 = vld [vmem:[%s3405_s22 + $0x278] sm:$0xf] }
  0x5f   : > { %1657 = vmatpush.bf16.msrb.mxu3 %v2961_v36  ;;  %1619 = vmatpush.bf16.msrb.mxu0 %v2361_v43  ;;  %v3156_v36 = vld [vmem:[%s3405_s22 + $0x2bc] sm:$0xf0]  ;;  %v3012_v41 = vld [vmem:[%s3405_s22 + $0x5a8] sm:$0xf]  ;;  %v2796_v53 = vld [vmem:[%s3405_s22 + $0x3f8] sm:$0xf] }
  0x60   : > { %1632 = vmatpush.bf16.msrb.mxu1 %v2553_v44  ;;  %v2629_v43 = vor.u32 %v3156_v36, %v2628_v34  ;;  %v2821_v44 = vor.u32 %v3204_v38, %v2820_v37  ;;  %v3198_v54 = vld [vmem:[%s3405_s22 + $0x40c] sm:$0xf0]  ;;  %v3013_v55 = vor.u32 %v3252_v42, %v3012_v41  ;;  %v2388_v61 = vld [vmem:[%s3405_s22 + $0xc8] sm:$0xf]  ;;  %v3096_v62 = vld [vmem:[%s3405_s22 + $0xdc] sm:$0xf0] }
  0x61   : > { %1645 = vmatpush.bf16.msrb.mxu2 %v2745_v48  ;;  %v2412_v48 = vld [vmem:[%s3405_s22 + $0xf8] sm:$0xf]  ;;  %v2580_v63 = vld [vmem:[%s3405_s22 + $0x248] sm:$0xf]  ;;  %v3192_v2 = vld [vmem:[%s3405_s22 + $0x3dc] sm:$0xf0]  ;;  %v2389_v4 = vor.u32 %v3096_v62, %v2388_v61 }
  0x62   : > { %v2413_v56 = vor.u32 %v3102_v49, %v2412_v48  ;;  %v2772_v1 = vld [vmem:[%s3405_s22 + $0x3c8] sm:$0xf]  ;;  %v3240_v6 = vld [vmem:[%s3405_s22 + $0x55c] sm:$0xf0]  ;;  %v2364_v9 = vld [vmem:[%s3405_s22 + $0x98] sm:$0xf] }
  0x63   : > { %1658 = vmatpush.bf16.msrb.mxu3 %v2937_v52  ;;  %1620 = vmatpush.bf16.msrb.mxu0 %v2337_v57  ;;  %v3150_v52 = vld [vmem:[%s3405_s22 + $0x28c] sm:$0xf0]  ;;  %v2988_v57 = vld [vmem:[%s3405_s22 + $0x578] sm:$0xf]  ;;  %v2964_v5 = vld [vmem:[%s3405_s22 + $0x548] sm:$0xf] }
  0x64   : > { %1633 = vmatpush.bf16.msrb.mxu1 %v2529_v58  ;;  %v3246_v58 = vld [vmem:[%s3405_s22 + $0x58c] sm:$0xf0]  ;;  %v2605_v59 = vor.u32 %v3150_v52, %v2604_v50  ;;  %v2556_v11 = vld [vmem:[%s3405_s22 + $0x218] sm:$0xf]  ;;  %v2965_v15 = vor.u32 %v3240_v6, %v2964_v5  ;;  %v2340_v21 = vld [vmem:[%s3405_s22 + $0x68] sm:$0xf] }
  0x65   : > { %1646 = vmatpush.bf16.msrb.mxu2 %v2721_v60  ;;  %v2797_v60 = vor.u32 %v3198_v54, %v2796_v53  ;;  %v2989_v3 = vor.u32 %v3246_v58, %v2988_v57  ;;  %v3090_v10 = vld [vmem:[%s3405_s22 + $0xac] sm:$0xf0]  ;;  %v2748_v13 = vld [vmem:[%s3405_s22 + $0x398] sm:$0xf]  ;;  %v3084_v22 = vld [vmem:[%s3405_s22 + $0x7c] sm:$0xf0] }
  0x66   : > { %v3186_v14 = vld [vmem:[%s3405_s22 + $0x3ac] sm:$0xf0]  ;;  %v2940_v17 = vld [vmem:[%s3405_s22 + $0x518] sm:$0xf]  ;;  %v2724_v25 = vld [vmem:[%s3405_s22 + $0x368] sm:$0xf] }
  0x67   : > { %1659 = vmatpush.bf16.msrb.mxu3 %v2913_v0  ;;  %1621 = vmatpush.bf16.msrb.mxu0 %v2313_v7  ;;  %v3144_v0 = vld [vmem:[%s3405_s22 + $0x25c] sm:$0xf0]  ;;  %v3234_v18 = vld [vmem:[%s3405_s22 + $0x52c] sm:$0xf0]  ;;  %v2749_v20 = vor.u32 %v3186_v14, %v2748_v13  ;;  %v2916_v29 = vld [vmem:[%s3405_s22 + $0x4e8] sm:$0xf] }
  0x68   : > { %1634 = vmatpush.bf16.msrb.mxu1 %v2505_v8  ;;  %v2581_v7 = vor.u32 %v3144_v0, %v2580_v63  ;;  %v2773_v8 = vor.u32 %v3192_v2, %v2772_v1  ;;  %v3180_v26 = vld [vmem:[%s3405_s22 + $0x37c] sm:$0xf0]  ;;  %v2316_v33 = vld [vmem:[%s3405_s22 + $0x38] sm:$0xf]  ;;  %v3078_v34 = vld [vmem:[%s3405_s22 + $0x4c] sm:$0xf0] }
  0x69   : > { %1647 = vmatpush.bf16.msrb.mxu2 %v2697_v12  ;;  %v3138_v12 = vld [vmem:[%s3405_s22 + $0x22c] sm:$0xf0]  ;;  %v2725_v32 = vor.u32 %v3180_v26, %v2724_v25  ;;  %v2700_v37 = vld [vmem:[%s3405_s22 + $0x338] sm:$0xf]  ;;  %v2292_v42 = vld [vmem:[%s3405_s22 + $0x8] sm:$0xf] }
  0x6a   : > { %v2557_v19 = vor.u32 %v3138_v12, %v2556_v11  ;;  %v3126_v36 = vld [vmem:[%s3405_s22 + $0x1cc] sm:$0xf0]  ;;  %v2484_v48 = vld [vmem:[%s3405_s22 + $0x188] sm:$0xf]  ;;  %v3120_v49 = vld [vmem:[%s3405_s22 + $0x19c] sm:$0xf0] }
  0x6b   : > { %1660 = vmatpush.bf16.msrb.mxu3 %v2889_v16  ;;  %1622 = vmatpush.bf16.msrb.mxu0 %v2289_v23  ;;  %v2365_v16 = vor.u32 %v3090_v10, %v2364_v9  ;;  %v2532_v23 = vld [vmem:[%s3405_s22 + $0x1e8] sm:$0xf]  ;;  %v3174_v38 = vld [vmem:[%s3405_s22 + $0x34c] sm:$0xf0]  ;;  %v3168_v54 = vld [vmem:[%s3405_s22 + $0x31c] sm:$0xf0] }
  0x6c   : > { %1635 = vmatpush.bf16.msrb.mxu1 %v2481_v24  ;;  %v3132_v24 = vld [vmem:[%s3405_s22 + $0x1fc] sm:$0xf0]  ;;  %v3222_v41 = vld [vmem:[%s3405_s22 + $0x4cc] sm:$0xf0]  ;;  %v2701_v52 = vor.u32 %v3174_v38, %v2700_v37  ;;  %v2676_v53 = vld [vmem:[%s3405_s22 + $0x308] sm:$0xf] }
  0x6d   : > { %1648 = vmatpush.bf16.msrb.mxu2 %v2673_v27  ;;  %v2941_v27 = vor.u32 %v3234_v18, %v2940_v17  ;;  %v3255_v57 = vld [vmem:[%s3405_s22 + $0x5dc] sm:$0xf]  ;;  %v3038_v58 = vld [vmem:[%s3405_s22 + $0x5f0] sm:$0x10]  ;;  %v2868_v1 = vld [vmem:[%s3405_s22 + $0x488] sm:$0xf] }
  0x6e   : > { %1623 = vmatmul.bf16.vlgmr.msrb.gmra.mxu0 %v3523_v45  ;;  %v2654_v61 = vld [vmem:[%s3405_s22 + $0x2f0] sm:$0xf0]  ;;  %v3207_v62 = vld [vmem:[%s3405_s22 + $0x45c] sm:$0xf]  ;;  %v3216_v2 = vld [vmem:[%s3405_s22 + $0x49c] sm:$0xf0]  ;;  %v3041_v5 = vor.u32 %v3255_v57, %v3038_v58 }
  0x6f   : > { %1667 = vmatpush.bf16.msra.mxu0 %v2461_v28  ;;  %1661 = vmatpush.bf16.msrb.mxu3 %v2865_v35  ;;  %v2341_v28 = vor.u32 %v3084_v22, %v2340_v21  ;;  %v2508_v35 = vld [vmem:[%s3405_s22 + $0x1b8] sm:$0xf]  ;;  %v2846_v0 = vld [vmem:[%s3405_s22 + $0x470] sm:$0xf0]  ;;  %v2869_v10 = vor.u32 %v3216_v2, %v2868_v1  ;;  %v2438_v11 = vld [vmem:[%s3405_s22 + $0x140] sm:$0xf0] }
  0x70   : > { %1680 = vmatpush.bf16.msra.mxu1 %v2653_v30  ;;  %1649 = vmatmul.bf16.vlgmr.msrb.gmra.mxu2 %v3527_v47  ;;  %v3228_v30 = vld [vmem:[%s3405_s22 + $0x4fc] sm:$0xf0]  ;;  %v2509_v50 = vor.u32 %v3126_v36, %v2508_v35  ;;  %v2849_v9 = vor.u32 %v3207_v62, %v2846_v0  ;;  %v3153_v12 = vld [vmem:[%s3405_s22 + $0x2ac] sm:$0xf]  ;;  %v2630_v13 = vld [vmem:[%s3405_s22 + $0x2c0] sm:$0xf0] }
  0x71   : > { %1693 = vmatpush.bf16.msra.mxu2 %v2845_v31  ;;  %1636 = vmatmul.bf16.vlgmr.msrb.gmra.mxu1 %v3525_v46  ;;  %v2533_v31 = vor.u32 %v3132_v24, %v2532_v23  ;;  %v3201_v14 = vld [vmem:[%s3405_s22 + $0x42c] sm:$0xf]  ;;  %v3014_v18 = vld [vmem:[%s3405_s22 + $0x5c0] sm:$0xf0]  ;;  %v3099_v21 = vld [vmem:[%s3405_s22 + $0xfc] sm:$0xf] }
  0x72   : > { %3051 = vmatmul.msk.bf16.vlgmr.msrb.gmra.mxu3 %vm1541_vm1, %v3532_v51  ;;  %v3249_v17 = vld [vmem:[%s3405_s22 + $0x5ac] sm:$0xf]  ;;  %v2414_v23 = vld [vmem:[%s3405_s22 + $0x110] sm:$0xf0]  ;;  %v3147_v24 = vld [vmem:[%s3405_s22 + $0x27c] sm:$0xf] }
  0x73   : > { %1706 = vmatpush.bf16.msra.mxu3 %v1552_v39  ;;  %1668 = vmatpush.bf16.msra.mxu0 %v2437_v40  ;;  %v2917_v39 = vor.u32 %v3228_v30, %v2916_v29  ;;  %v2892_v40 = vld [vmem:[%s3405_s22 + $0x4b8] sm:$0xf]  ;;  %v2606_v25 = vld [vmem:[%s3405_s22 + $0x290] sm:$0xf0]  ;;  %v3017_v26 = vor.u32 %v3249_v17, %v3014_v18  ;;  %v3243_v29 = vld [vmem:[%s3405_s22 + $0x57c] sm:$0xf] }
  0x74   : > { %1681 = vmatpush.bf16.msra.mxu1 %v2629_v43  ;;  %v2317_v43 = vor.u32 %v3078_v34, %v2316_v33  ;;  %v2990_v30 = vld [vmem:[%s3405_s22 + $0x590] sm:$0xf0]  ;;  %v3093_v33 = vld [vmem:[%s3405_s22 + $0xcc] sm:$0xf]  ;;  %v2390_v35 = vld [vmem:[%s3405_s22 + $0xe0] sm:$0xf0] }
  0x75   : > { %1694 = vmatpush.bf16.msra.mxu2 %v2821_v44  ;;  %v3072_v44 = vld [vmem:[%s3405_s22 + $0x1c] sm:$0xf0]  ;;  %v3141_v36 = vld [vmem:[%s3405_s22 + $0x24c] sm:$0xf]  ;;  %v2582_v37 = vld [vmem:[%s3405_s22 + $0x260] sm:$0xf0]  ;;  %v2993_v38 = vor.u32 %v3243_v29, %v2990_v30 }
  0x76   : > { %v2293_v63 = vor.u32 %v3072_v44, %v2292_v42  ;;  %v2966_v42 = vld [vmem:[%s3405_s22 + $0x560] sm:$0xf0]  ;;  %v2585_v44 = vor.u32 %v3141_v36, %v2582_v37  ;;  %v3231_v57 = vld [vmem:[%s3405_s22 + $0x51c] sm:$0xf]  ;;  %v2942_v58 = vld [vmem:[%s3405_s22 + $0x530] sm:$0xf0] }
  0x77   : > { %1707 = vmatpush.bf16.msra.mxu3 %v3013_v55  ;;  %1669 = vmatpush.bf16.msra.mxu0 %v2413_v56  ;;  %v3111_v55 = vld [vmem:[%s3405_s22 + $0x15c] sm:$0xf]  ;;  %v2462_v56 = vld [vmem:[%s3405_s22 + $0x170] sm:$0xf0]  ;;  %v3129_v0 = vld [vmem:[%s3405_s22 + $0x1ec] sm:$0xf]  ;;  %v2945_v2 = vor.u32 %v3231_v57, %v2942_v58 }
  0x78   : > { %1682 = vmatpush.bf16.msra.mxu1 %v2605_v59  ;;  %v2893_v59 = vor.u32 %v3222_v41, %v2892_v40  ;;  %v2465_v6 = vor.u32 %v3111_v55, %v2462_v56  ;;  %v2774_v40 = vld [vmem:[%s3405_s22 + $0x3e0] sm:$0xf0]  ;;  %v3237_v41 = vld [vmem:[%s3405_s22 + $0x54c] sm:$0xf]  ;;  %v3183_v55 = vld [vmem:[%s3405_s22 + $0x39c] sm:$0xf] }
  0x79   : > { %1695 = vmatpush.bf16.msra.mxu2 %v2797_v60  ;;  %v3159_v60 = vld [vmem:[%s3405_s22 + $0x2dc] sm:$0xf]  ;;  %v2750_v56 = vld [vmem:[%s3405_s22 + $0x3b0] sm:$0xf0]  ;;  %v2534_v1 = vld [vmem:[%s3405_s22 + $0x200] sm:$0xf0] }
  0x7a   : > { %v2753_v62 = vor.u32 %v3183_v55, %v2750_v56  ;;  %v3219_v17 = vld [vmem:[%s3405_s22 + $0x4bc] sm:$0xf]  ;;  %v2894_v18 = vld [vmem:[%s3405_s22 + $0x4d0] sm:$0xf0]  ;;  %v3115_v29 = vld [vmem:[%s3405_s22 + $0x174] sm:$0xf0] }
  0x7b   : > { %1708 = vmatpush.bf16.msra.mxu3 %v2989_v3  ;;  %1670 = vmatpush.bf16.msra.mxu0 %v2389_v4  ;;  %v2485_v3 = vor.u32 %v3120_v49, %v2484_v48  ;;  %v2677_v4 = vor.u32 %v3168_v54, %v2676_v53  ;;  %v3087_v48 = vld [vmem:[%s3405_s22 + $0x9c] sm:$0xf]  ;;  %v2558_v53 = vld [vmem:[%s3405_s22 + $0x230] sm:$0xf0]  ;;  %v2969_v54 = vor.u32 %v3237_v41, %v2966_v42  ;;  %v3211_v36 = vld [vmem:[%s3405_s22 + $0x474] sm:$0xf0] }
  0x7c   : > { %1683 = vmatpush.bf16.msra.mxu1 %v2581_v7  ;;  %v2657_v7 = vor.u32 %v3159_v60, %v2654_v61  ;;  %v3081_v61 = vld [vmem:[%s3405_s22 + $0x6c] sm:$0xf]  ;;  %v2897_v30 = vor.u32 %v3219_v17, %v2894_v18  ;;  %v2828_v55 = vld [vmem:[%s3405_s22 + $0x430] sm:$0xf]  ;;  %v3205_v56 = vld [vmem:[%s3405_s22 + $0x444] sm:$0xf0] }
  0x7d   : > { %1696 = vmatpush.bf16.msra.mxu2 %v2773_v8  ;;  %v3105_v8 = vld [vmem:[%s3405_s22 + $0x12c] sm:$0xf] }
  0x7f   : > { %1709 = vmatpush.bf16.msra.mxu3 %v2965_v15  ;;  %1671 = vmatpush.bf16.msra.mxu0 %v2365_v16  ;;  %v2822_v15 = vld [vmem:[%s3405_s22 + $0x440] sm:$0xf0]  ;;  %v1555_v16 = vsel %vm1544_vm0, %v3041_v5, 0  ;;  %v3225_v5 = vld [vmem:[%s3405_s22 + $0x4ec] sm:$0xf] }
  0x80   : > { %1684 = vmatpush.bf16.msra.mxu1 %v2557_v19  ;;  %v2441_v19 = vor.u32 %v3105_v8, %v2438_v11  ;;  %v2825_v22 = vor.u32 %v3201_v14, %v2822_v15  ;;  %v2537_v8 = vor.u32 %v3129_v0, %v2534_v1  ;;  %v2318_v11 = vld [vmem:[%s3405_s22 + $0x50] sm:$0xf0]  ;;  %v3171_v15 = vld [vmem:[%s3405_s22 + $0x33c] sm:$0xf]  ;;  %v3103_v0 = vld [vmem:[%s3405_s22 + $0x114] sm:$0xf0] }
  0x81   : > { %1697 = vmatpush.bf16.msra.mxu2 %v2749_v20  ;;  %v2633_v20 = vor.u32 %v3153_v12, %v2630_v13  ;;  %v3123_v12 = vld [vmem:[%s3405_s22 + $0x1bc] sm:$0xf]  ;;  %v2510_v13 = vld [vmem:[%s3405_s22 + $0x1d0] sm:$0xf0]  ;;  %v2612_v1 = vld [vmem:[%s3405_s22 + $0x280] sm:$0xf] }
  0x83   : > { %1710 = vmatpush.bf16.msra.mxu3 %v2941_v27  ;;  %1672 = vmatpush.bf16.msra.mxu0 %v2341_v28  ;;  %v3195_v27 = vld [vmem:[%s3405_s22 + $0x3fc] sm:$0xf]  ;;  %v2798_v28 = vld [vmem:[%s3405_s22 + $0x410] sm:$0xf0] }
  0x84   : > { %1685 = vmatpush.bf16.msra.mxu1 %v2533_v31  ;;  %v2417_v31 = vor.u32 %v3099_v21, %v2414_v23  ;;  %v2801_v34 = vor.u32 %v3195_v27, %v2798_v28  ;;  %v3117_v23 = vld [vmem:[%s3405_s22 + $0x18c] sm:$0xf]  ;;  %v2678_v27 = vld [vmem:[%s3405_s22 + $0x320] sm:$0xf0]  ;;  %v2468_v28 = vld [vmem:[%s3405_s22 + $0x160] sm:$0xf] }
  0x85   : > { %1698 = vmatpush.bf16.msra.mxu2 %v2725_v32  ;;  %v2609_v32 = vor.u32 %v3147_v24, %v2606_v25  ;;  %v2486_v24 = vld [vmem:[%s3405_s22 + $0x1a0] sm:$0xf0]  ;;  %v3165_v25 = vld [vmem:[%s3405_s22 + $0x30c] sm:$0xf]  ;;  %v2469_v42 = vor.u32 %v3115_v29, %v2468_v28  ;;  %v3187_v28 = vld [vmem:[%s3405_s22 + $0x3b4] sm:$0xf0] }
  0x86   : > { %v2681_v41 = vor.u32 %v3165_v25, %v2678_v27  ;;  %v2564_v25 = vld [vmem:[%s3405_s22 + $0x220] sm:$0xf] }
  0x87   : > { %1711 = vmatpush.bf16.msra.mxu3 %v2917_v39  ;;  %1673 = vmatpush.bf16.msra.mxu0 %v2317_v43  ;;  %v3189_v39 = vld [vmem:[%s3405_s22 + $0x3cc] sm:$0xf]  ;;  %v2393_v43 = vor.u32 %v3093_v33, %v2390_v35  ;;  %v3259_v33 = vld [vmem:[%s3405_s22 + $0x5f4] sm:$0x10]  ;;  %v2852_v35 = vld [vmem:[%s3405_s22 + $0x460] sm:$0xf] }
  0x88   : > { %1686 = vmatpush.bf16.msra.mxu1 %v2509_v50  ;;  %v2777_v49 = vor.u32 %v3189_v39, %v2774_v40  ;;  %v2366_v50 = vld [vmem:[%s3405_s22 + $0xb0] sm:$0xf0]  ;;  %v3213_v39 = vld [vmem:[%s3405_s22 + $0x48c] sm:$0xf]  ;;  %v2870_v40 = vld [vmem:[%s3405_s22 + $0x4a0] sm:$0xf0] }
  0x89   : > { %1699 = vmatpush.bf16.msra.mxu2 %v2701_v52  ;;  %v3135_v52 = vld [vmem:[%s3405_s22 + $0x21c] sm:$0xf]  ;;  %v2756_v27 = vld [vmem:[%s3405_s22 + $0x3a0] sm:$0xf] }
  0x8a   : > { %v2561_v60 = vor.u32 %v3135_v52, %v2558_v53  ;;  %v2636_v52 = vld [vmem:[%s3405_s22 + $0x2b0] sm:$0xf]  ;;  %v2873_v53 = vor.u32 %v3213_v39, %v2870_v40  ;;  %v3181_v40 = vld [vmem:[%s3405_s22 + $0x384] sm:$0xf0] }
  0x8b   : > { %1712 = vmatpush.bf16.msra.mxu3 %v2893_v59  ;;  %1674 = vmatpush.bf16.msra.mxu0 %v2293_v63  ;;  %v2369_v59 = vor.u32 %v3087_v48, %v2366_v50  ;;  %v2342_v63 = vld [vmem:[%s3405_s22 + $0x80] sm:$0xf0]  ;;  %v2853_v48 = vor.u32 %v3211_v36, %v2852_v35  ;;  %v3109_v50 = vld [vmem:[%s3405_s22 + $0x144] sm:$0xf0]  ;;  %v2348_v35 = vld [vmem:[%s3405_s22 + $0x70] sm:$0xf] }
  0x8c   : > { %1687 = vmatpush.bf16.msra.mxu1 %v2485_v3  ;;  %v3177_v3 = vld [vmem:[%s3405_s22 + $0x36c] sm:$0xf]  ;;  %v3085_v36 = vld [vmem:[%s3405_s22 + $0x84] sm:$0xf0]  ;;  %v2732_v39 = vld [vmem:[%s3405_s22 + $0x370] sm:$0xf] }
  0x8d   : > { %1700 = vmatpush.bf16.msra.mxu2 %v2677_v4  ;;  %v2726_v4 = vld [vmem:[%s3405_s22 + $0x380] sm:$0xf0] }
  0x8e   : > { %1675 = vmatmul.bf16.vlgmr.msra.gmra.mxu0 %v3523_v45 }
  0x8f   : > { %1719 = vmatpush.bf16.msrb.mxu0 %v2465_v6  ;;  %1713 = vmatpush.bf16.msra.mxu3 %v2869_v10  ;;  %v2918_v6 = vld [vmem:[%s3405_s22 + $0x500] sm:$0xf0]  ;;  %v2729_v10 = vor.u32 %v3177_v3, %v2726_v4  ;;  %v2804_v3 = vld [vmem:[%s3405_s22 + $0x400] sm:$0xf]  ;;  %v3199_v4 = vld [vmem:[%s3405_s22 + $0x414] sm:$0xf0] }
  0x90   : > { %1732 = vmatpush.bf16.msrb.mxu1 %v2657_v7  ;;  %1701 = vmatmul.bf16.vlgmr.msra.gmra.mxu2 %v3527_v47  ;;  %v2345_v7 = vor.u32 %v3081_v61, %v2342_v63  ;;  %v2921_v14 = vor.u32 %v3225_v5, %v2918_v6  ;;  %v2420_v63 = vld [vmem:[%s3405_s22 + $0x100] sm:$0xf] }
  0x91   : > { %1745 = vmatpush.bf16.msrb.mxu2 %v2849_v9  ;;  %1688 = vmatmul.bf16.vlgmr.msra.gmra.mxu1 %v3525_v46  ;;  %v3075_v9 = vld [vmem:[%s3405_s22 + $0x3c] sm:$0xf]  ;;  %v2421_v6 = vor.u32 %v3103_v0, %v2420_v63  ;;  %v2492_v63 = vld [vmem:[%s3405_s22 + $0x190] sm:$0xf]  ;;  %v3121_v0 = vld [vmem:[%s3405_s22 + $0x1a4] sm:$0xf0] }
  0x92   : > { %3052 = vmatmul.msk.bf16.vlgmr.msra.gmra.mxu3 %vm1541_vm1, %v3532_v51  ;;  %v2321_v21 = vor.u32 %v3075_v9, %v2318_v11  ;;  %v2396_v11 = vld [vmem:[%s3405_s22 + $0xd0] sm:$0xf] }
  0x93   : > { %1758 = vmatpush.bf16.msrb.mxu3 %v1555_v16  ;;  %1720 = vmatpush.bf16.msrb.mxu0 %v2441_v19  ;;  %v2702_v16 = vld [vmem:[%s3405_s22 + $0x350] sm:$0xf0]  ;;  %v3069_v19 = vld [vmem:[%s3405_s22 + $0xc] sm:$0xf] }
  0x94   : > { %1733 = vmatpush.bf16.msrb.mxu1 %v2633_v20  ;;  %v2294_v20 = vld [vmem:[%s3405_s22 + $0x20] sm:$0xf0] }
  0x95   : > { %1746 = vmatpush.bf16.msrb.mxu2 %v2825_v22  ;;  %v2513_v22 = vor.u32 %v3123_v12, %v2510_v13  ;;  %v2297_v37 = vor.u32 %v3069_v19, %v2294_v20  ;;  %v3097_v12 = vld [vmem:[%s3405_s22 + $0xe4] sm:$0xf0]  ;;  %v2588_v13 = vld [vmem:[%s3405_s22 + $0x250] sm:$0xf] }
  0x96   : > { %v2397_v18 = vor.u32 %v3097_v12, %v2396_v11  ;;  %v2972_v19 = vld [vmem:[%s3405_s22 + $0x550] sm:$0xf]  ;;  %v3241_v20 = vld [vmem:[%s3405_s22 + $0x564] sm:$0xf0]  ;;  %v2662_v11 = vld [vmem:[%s3405_s22 + $0x2f8] sm:$0xf0] }
  0x97   : > { %1759 = vmatpush.bf16.msrb.mxu3 %v3017_v26  ;;  %1721 = vmatpush.bf16.msrb.mxu0 %v2417_v31  ;;  %v2705_v26 = vor.u32 %v3171_v15, %v2702_v16  ;;  %v2660_v31 = vld [vmem:[%s3405_s22 + $0x2e0] sm:$0xf]  ;;  %v2780_v15 = vld [vmem:[%s3405_s22 + $0x3d0] sm:$0xf]  ;;  %v3193_v16 = vld [vmem:[%s3405_s22 + $0x3e4] sm:$0xf0]  ;;  %v2973_v29 = vor.u32 %v3241_v20, %v2972_v19 }
  0x98   : > { %1734 = vmatpush.bf16.msrb.mxu1 %v2609_v32  ;;  %v3044_v32 = vld [vmem:[%s3405_s22 + $0x5e0] sm:$0xf]  ;;  %v3208_v12 = vld [vmem:[%s3405_s22 + $0x464] sm:$0xf] }
  0x99   : > { %1747 = vmatpush.bf16.msrb.mxu2 %v2801_v34  ;;  %v3163_v34 = vld [vmem:[%s3405_s22 + $0x2f4] sm:$0xf0] }
  0x9b   : > { %1760 = vmatpush.bf16.msrb.mxu3 %v2993_v38  ;;  %1722 = vmatpush.bf16.msrb.mxu0 %v2393_v43  ;;  %v2489_v38 = vor.u32 %v3117_v23, %v2486_v24  ;;  %v3045_v43 = vor.u32 %v3259_v33, %v3044_v32  ;;  %v2372_v23 = vld [vmem:[%s3405_s22 + $0xa0] sm:$0xf]  ;;  %v3091_v24 = vld [vmem:[%s3405_s22 + $0xb4] sm:$0xf0] }
  0x9c   : > { %1735 = vmatpush.bf16.msrb.mxu1 %v2585_v44  ;;  %v2661_v44 = vor.u32 %v3163_v34, %v2660_v31  ;;  %v2948_v31 = vld [vmem:[%s3405_s22 + $0x520] sm:$0xf]  ;;  %v3235_v32 = vld [vmem:[%s3405_s22 + $0x534] sm:$0xf0]  ;;  %v2757_v34 = vor.u32 %v3187_v28, %v2756_v27  ;;  %v2638_v27 = vld [vmem:[%s3405_s22 + $0x2c8] sm:$0xf0] }
  0x9d   : > { %1748 = vmatpush.bf16.msrb.mxu2 %v2777_v49  ;;  %v2444_v49 = vld [vmem:[%s3405_s22 + $0x130] sm:$0xf]  ;;  %v1558_v57 = vsel %vm1544_vm0, %v3045_v43, 0  ;;  %v3202_v28 = vld [vmem:[%s3405_s22 + $0x434] sm:$0xf] }
  0x9e   : > { %v2445_v58 = vor.u32 %v3109_v50, %v2444_v49  ;;  %v2924_v43 = vld [vmem:[%s3405_s22 + $0x4f0] sm:$0xf]  ;;  %v2733_v49 = vor.u32 %v3181_v40, %v2732_v39  ;;  %v2324_v50 = vld [vmem:[%s3405_s22 + $0x40] sm:$0xf]  ;;  %v2614_v39 = vld [vmem:[%s3405_s22 + $0x298] sm:$0xf0] }
  0x9f   : > { %1761 = vmatpush.bf16.msrb.mxu3 %v2969_v54  ;;  %1723 = vmatpush.bf16.msrb.mxu0 %v2369_v59  ;;  %v3157_v54 = vld [vmem:[%s3405_s22 + $0x2c4] sm:$0xf0]  ;;  %v3020_v59 = vld [vmem:[%s3405_s22 + $0x5b0] sm:$0xf] }
  0xa0   : > { %1736 = vmatpush.bf16.msrb.mxu1 %v2561_v60  ;;  %v3253_v60 = vld [vmem:[%s3405_s22 + $0x5c4] sm:$0xf0]  ;;  %v2637_v61 = vor.u32 %v3157_v54, %v2636_v52  ;;  %v3079_v52 = vld [vmem:[%s3405_s22 + $0x54] sm:$0xf0] }
  0xa1   : > { %1749 = vmatpush.bf16.msrb.mxu2 %v2753_v62  ;;  %v2829_v62 = vor.u32 %v3205_v56, %v2828_v55  ;;  %v3021_v5 = vor.u32 %v3253_v60, %v3020_v59  ;;  %v3127_v54 = vld [vmem:[%s3405_s22 + $0x1d4] sm:$0xf0]  ;;  %v2708_v55 = vld [vmem:[%s3405_s22 + $0x340] sm:$0xf]  ;;  %v2300_v60 = vld [vmem:[%s3405_s22 + $0x10] sm:$0xf] }
  0xa2   : > { %v3175_v56 = vld [vmem:[%s3405_s22 + $0x354] sm:$0xf0] }
  0xa3   : > { %1762 = vmatpush.bf16.msrb.mxu3 %v2945_v2  ;;  %1724 = vmatpush.bf16.msrb.mxu0 %v2345_v7  ;;  %v3151_v2 = vld [vmem:[%s3405_s22 + $0x294] sm:$0xf0]  ;;  %v2996_v7 = vld [vmem:[%s3405_s22 + $0x580] sm:$0xf] }
  0xa4   : > { %1737 = vmatpush.bf16.msrb.mxu1 %v2537_v8  ;;  %v3247_v8 = vld [vmem:[%s3405_s22 + $0x594] sm:$0xf0]  ;;  %v2613_v9 = vor.u32 %v3151_v2, %v2612_v1  ;;  %v2709_v2 = vor.u32 %v3175_v56, %v2708_v55  ;;  %v2782_v55 = vld [vmem:[%s3405_s22 + $0x3e8] sm:$0xf0]  ;;  %v3238_v56 = vld [vmem:[%s3405_s22 + $0x554] sm:$0xf] }
  0xa5   : > { %1750 = vmatpush.bf16.msrb.mxu2 %v2729_v10  ;;  %v2805_v10 = vor.u32 %v3199_v4, %v2804_v3  ;;  %v2997_v17 = vor.u32 %v3247_v8, %v2996_v7  ;;  %v3223_v59 = vld [vmem:[%s3405_s22 + $0x4d4] sm:$0xf0]  ;;  %v2684_v3 = vld [vmem:[%s3405_s22 + $0x310] sm:$0xf]  ;;  %v3169_v4 = vld [vmem:[%s3405_s22 + $0x324] sm:$0xf0] }
  0xa6   : > { %v3256_v7 = vld [vmem:[%s3405_s22 + $0x5e4] sm:$0xf]  ;;  %v3046_v8 = vld [vmem:[%s3405_s22 + $0x5f8] sm:$0x10] }
  0xa7   : > { %1763 = vmatpush.bf16.msrb.mxu3 %v2921_v14  ;;  %1725 = vmatpush.bf16.msrb.mxu0 %v2321_v21  ;;  %v3145_v14 = vld [vmem:[%s3405_s22 + $0x264] sm:$0xf0]  ;;  %v3049_v19 = vor.u32 %v3256_v7, %v3046_v8  ;;  %v3082_v7 = vld [vmem:[%s3405_s22 + $0x74] sm:$0xf] }
  0xa8   : > { %1738 = vmatpush.bf16.msrb.mxu1 %v2513_v22  ;;  %v2589_v21 = vor.u32 %v3145_v14, %v2588_v13  ;;  %v2781_v22 = vor.u32 %v3193_v16, %v2780_v15  ;;  %v2854_v14 = vld [vmem:[%s3405_s22 + $0x478] sm:$0xf0]  ;;  %v2876_v15 = vld [vmem:[%s3405_s22 + $0x490] sm:$0xf]  ;;  %v3217_v16 = vld [vmem:[%s3405_s22 + $0x4a4] sm:$0xf0] }
  0xa9   : > { %1751 = vmatpush.bf16.msrb.mxu2 %v2705_v26  ;;  %v3139_v26 = vld [vmem:[%s3405_s22 + $0x234] sm:$0xf0] }
  0xaa   : > { %v2565_v33 = vor.u32 %v3139_v26, %v2564_v25  ;;  %v2446_v25 = vld [vmem:[%s3405_s22 + $0x148] sm:$0xf0]  ;;  %v3154_v26 = vld [vmem:[%s3405_s22 + $0x2b4] sm:$0xf] }
  0xab   : > { %1764 = vmatpush.bf16.msrb.mxu3 %v2897_v30  ;;  %1726 = vmatpush.bf16.msrb.mxu0 %v2297_v37  ;;  %v2373_v30 = vor.u32 %v3091_v24, %v2372_v23  ;;  %v2540_v37 = vld [vmem:[%s3405_s22 + $0x1f0] sm:$0xf]  ;;  %v2857_v23 = vor.u32 %v3208_v12, %v2854_v14  ;;  %v2877_v24 = vor.u32 %v3217_v16, %v2876_v15  ;;  %v2734_v14 = vld [vmem:[%s3405_s22 + $0x388] sm:$0xf0]  ;;  %v3226_v15 = vld [vmem:[%s3405_s22 + $0x4f4] sm:$0xf] }
  0xac   : > { %1739 = vmatpush.bf16.msrb.mxu1 %v2489_v38  ;;  %v3133_v38 = vld [vmem:[%s3405_s22 + $0x204] sm:$0xf0]  ;;  %v2926_v16 = vld [vmem:[%s3405_s22 + $0x508] sm:$0xf0] }
  0xad   : > { %1752 = vmatpush.bf16.msrb.mxu2 %v2681_v41  ;;  %v2949_v41 = vor.u32 %v3235_v32, %v2948_v31  ;;  %v3250_v31 = vld [vmem:[%s3405_s22 + $0x5b4] sm:$0xf]  ;;  %v3022_v32 = vld [vmem:[%s3405_s22 + $0x5c8] sm:$0xf0] }
  0xae   : > { %1727 = vmatmul.bf16.vlgmr.msrb.gmra.mxu0 %v3523_v45  ;;  %v3025_v40 = vor.u32 %v3250_v31, %v3022_v32  ;;  %v3070_v31 = vld [vmem:[%s3405_s22 + $0x14] sm:$0xf] }
  0xaf   : > { %1771 = vmatpush.bf16.msra.mxu0 %v2469_v42  ;;  %1765 = vmatpush.bf16.msrb.mxu3 %v2873_v53  ;;  %v2349_v42 = vor.u32 %v3085_v36, %v2348_v35  ;;  %v2516_v53 = vld [vmem:[%s3405_s22 + $0x1c0] sm:$0xf]  ;;  %v3100_v35 = vld [vmem:[%s3405_s22 + $0x104] sm:$0xf] }
  0xb0   : > { %1784 = vmatpush.bf16.msra.mxu1 %v2661_v44  ;;  %1753 = vmatmul.bf16.vlgmr.msrb.gmra.mxu2 %v3527_v47  ;;  %v3229_v44 = vld [vmem:[%s3405_s22 + $0x504] sm:$0xf0]  ;;  %v2517_v1 = vor.u32 %v3127_v54, %v2516_v53  ;;  %v3190_v54 = vld [vmem:[%s3405_s22 + $0x3d4] sm:$0xf] }
  0xb1   : > { %1797 = vmatpush.bf16.msra.mxu2 %v2853_v48  ;;  %1740 = vmatmul.bf16.vlgmr.msrb.gmra.mxu1 %v3525_v46  ;;  %v2541_v48 = vor.u32 %v3133_v38, %v2540_v37  ;;  %v2422_v37 = vld [vmem:[%s3405_s22 + $0x118] sm:$0xf0]  ;;  %v3148_v38 = vld [vmem:[%s3405_s22 + $0x284] sm:$0xf] }
  0xb2   : > { %3053 = vmatmul.msk.bf16.vlgmr.msrb.gmra.mxu3 %vm1541_vm1, %v3532_v51 }
  0xb3   : > { %1810 = vmatpush.bf16.msra.mxu3 %v1558_v57  ;;  %1772 = vmatpush.bf16.msra.mxu0 %v2445_v58  ;;  %v2925_v57 = vor.u32 %v3229_v44, %v2924_v43  ;;  %v2900_v58 = vld [vmem:[%s3405_s22 + $0x4c0] sm:$0xf]  ;;  %v3244_v43 = vld [vmem:[%s3405_s22 + $0x584] sm:$0xf]  ;;  %v2998_v44 = vld [vmem:[%s3405_s22 + $0x598] sm:$0xf0] }
  0xb4   : > { %1785 = vmatpush.bf16.msra.mxu1 %v2637_v61  ;;  %v2325_v61 = vor.u32 %v3079_v52, %v2324_v50  ;;  %v3094_v50 = vld [vmem:[%s3405_s22 + $0xd4] sm:$0xf]  ;;  %v2590_v52 = vld [vmem:[%s3405_s22 + $0x268] sm:$0xf0]  ;;  %v3001_v53 = vor.u32 %v3244_v43, %v2998_v44 }
  0xb5   : > { %1798 = vmatpush.bf16.msra.mxu2 %v2829_v62  ;;  %v3073_v62 = vld [vmem:[%s3405_s22 + $0x24] sm:$0xf0]  ;;  %v2878_v43 = vld [vmem:[%s3405_s22 + $0x4a8] sm:$0xf0] }
  0xb6   : > { %v2301_v13 = vor.u32 %v3073_v62, %v2300_v60  ;;  %v2785_v60 = vor.u32 %v3190_v54, %v2782_v55  ;;  %v3136_v62 = vld [vmem:[%s3405_s22 + $0x224] sm:$0xf] }
  0xb7   : > { %1811 = vmatpush.bf16.msra.mxu3 %v3021_v5  ;;  %1773 = vmatpush.bf16.msra.mxu0 %v2421_v6  ;;  %v3112_v5 = vld [vmem:[%s3405_s22 + $0x164] sm:$0xf]  ;;  %v2470_v6 = vld [vmem:[%s3405_s22 + $0x178] sm:$0xf0] }
  0xb8   : > { %1786 = vmatpush.bf16.msra.mxu1 %v2613_v9  ;;  %v2901_v9 = vor.u32 %v3223_v59, %v2900_v58  ;;  %v2473_v20 = vor.u32 %v3112_v5, %v2470_v6  ;;  %v3088_v59 = vld [vmem:[%s3405_s22 + $0xa4] sm:$0xf] }
  0xb9   : > { %1799 = vmatpush.bf16.msra.mxu2 %v2805_v10  ;;  %v3160_v10 = vld [vmem:[%s3405_s22 + $0x2e4] sm:$0xf] }
  0xbb   : > { %1812 = vmatpush.bf16.msra.mxu3 %v2997_v17  ;;  %1774 = vmatpush.bf16.msra.mxu0 %v2397_v18  ;;  %v2493_v17 = vor.u32 %v3121_v0, %v2492_v63  ;;  %v2685_v18 = vor.u32 %v3169_v4, %v2684_v3  ;;  %v2566_v63 = vld [vmem:[%s3405_s22 + $0x238] sm:$0xf0]  ;;  %v3232_v3 = vld [vmem:[%s3405_s22 + $0x524] sm:$0xf] }
  0xbc   : > { %1787 = vmatpush.bf16.msra.mxu1 %v2589_v21  ;;  %v2665_v21 = vor.u32 %v3160_v10, %v2662_v11  ;;  %v2950_v4 = vld [vmem:[%s3405_s22 + $0x538] sm:$0xf0]  ;;  %v2569_v6 = vor.u32 %v3136_v62, %v2566_v63  ;;  %v3130_v10 = vld [vmem:[%s3405_s22 + $0x1f4] sm:$0xf]  ;;  %v2542_v11 = vld [vmem:[%s3405_s22 + $0x208] sm:$0xf0] }
  0xbd   : > { %1800 = vmatpush.bf16.msra.mxu2 %v2781_v22  ;;  %v3106_v22 = vld [vmem:[%s3405_s22 + $0x134] sm:$0xf]  ;;  %v2953_v12 = vor.u32 %v3232_v3, %v2950_v4  ;;  %v3292_v63 = vld [vmem:[#allocation1 + $0x1b] sm:$0xff] }
  0xbe   : > { %v1906_v62 = vld [vmem:[%s3839_s24 + $0x48] sm:$0xff] }
  0xbf   : > { %1813 = vmatpush.bf16.msra.mxu3 %v2973_v29  ;;  %1775 = vmatpush.bf16.msra.mxu0 %v2373_v30  ;;  %v2830_v29 = vld [vmem:[%s3405_s22 + $0x448] sm:$0xf0]  ;;  %v1561_v30 = vsel %vm1544_vm0, %v3049_v19, 0  ;;  %v3076_v19 = vld [vmem:[%s3405_s22 + $0x44] sm:$0xf] }
  0xc0   : > { %1788 = vmatpush.bf16.msra.mxu1 %v2565_v33  ;;  %v2449_v33 = vor.u32 %v3106_v22, %v2446_v25  ;;  %v2833_v36 = vor.u32 %v3202_v28, %v2830_v29  ;;  %v3124_v22 = vld [vmem:[%s3405_s22 + $0x1c4] sm:$0xf]  ;;  %v2902_v28 = vld [vmem:[%s3405_s22 + $0x4d8] sm:$0xf0] }
  0xc1   : > { %1801 = vmatpush.bf16.msra.mxu2 %v2757_v34  ;;  %v2641_v34 = vor.u32 %v3154_v26, %v2638_v27  ;;  %v3172_v25 = vld [vmem:[%s3405_s22 + $0x344] sm:$0xf]  ;;  %v2710_v26 = vld [vmem:[%s3405_s22 + $0x358] sm:$0xf0] }
  0xc2   : > { %v3220_v27 = vld [vmem:[%s3405_s22 + $0x4c4] sm:$0xf] }
  0xc3   : > { %1814 = vmatpush.bf16.msra.mxu3 %v2949_v41  ;;  %1776 = vmatpush.bf16.msra.mxu0 %v2349_v42  ;;  %v3196_v41 = vld [vmem:[%s3405_s22 + $0x404] sm:$0xf]  ;;  %v2806_v42 = vld [vmem:[%s3405_s22 + $0x418] sm:$0xf0] }
  0xc4   : > { %1789 = vmatpush.bf16.msra.mxu1 %v2541_v48  ;;  %v2425_v48 = vor.u32 %v3100_v35, %v2422_v37  ;;  %v3118_v35 = vld [vmem:[%s3405_s22 + $0x194] sm:$0xf] }
  0xc5   : > { %1802 = vmatpush.bf16.msra.mxu2 %v2733_v49  ;;  %v2617_v49 = vor.u32 %v3148_v38, %v2614_v39  ;;  %v2905_v38 = vor.u32 %v3220_v27, %v2902_v28  ;;  %v3166_v39 = vld [vmem:[%s3405_s22 + $0x314] sm:$0xf] }
  0xc6   : > { %v1902_v3 = vld [vmem:[%s3839_s24 + $0x28] sm:$0xff] }
  0xc7   : > { %1815 = vmatpush.bf16.msra.mxu3 %v2925_v57  ;;  %1777 = vmatpush.bf16.msra.mxu0 %v2325_v61  ;;  %v2974_v57 = vld [vmem:[%s3405_s22 + $0x568] sm:$0xf0]  ;;  %v2374_v61 = vld [vmem:[%s3405_s22 + $0xb8] sm:$0xf0] }
  0xc8   : > { %1790 = vmatpush.bf16.msra.mxu1 %v2517_v1  ;;  %v2977_v0 = vor.u32 %v3238_v56, %v2974_v57  ;;  %v3184_v1 = vld [vmem:[%s3405_s22 + $0x3a4] sm:$0xf]  ;;  %v2377_v5 = vor.u32 %v3088_v59, %v2374_v61  ;;  %v1905_v59 = vld [vmem:[%s3839_s24 + $0x40] sm:$0xff] }
  0xc9   : > { %1803 = vmatpush.bf16.msra.mxu2 %v2709_v2  ;;  %v2758_v2 = vld [vmem:[%s3405_s22 + $0x3b8] sm:$0xf0]  ;;  %v1908_v57 = vld [vmem:[%s3839_s24 + $0x58] sm:$0xff] }
  0xca   : > { %v2761_v8 = vor.u32 %v3184_v1, %v2758_v2  ;;  %v3291_v61 = vld [vmem:[#allocation1 + $0x12] sm:$0xff] }
  0xcb   : > { %1816 = vmatpush.bf16.msra.mxu3 %v2901_v9  ;;  %1778 = vmatpush.bf16.msra.mxu0 %v2301_v13  ;;  %v2350_v9 = vld [vmem:[%s3405_s22 + $0x88] sm:$0xf0]  ;;  %v3178_v13 = vld [vmem:[%s3405_s22 + $0x374] sm:$0xf] }
  0xcc   : > { %1791 = vmatpush.bf16.msra.mxu1 %v2493_v17  ;;  %v2353_v17 = vor.u32 %v3082_v7, %v2350_v9  ;;  %v1904_v1 = vld [vmem:[%s3839_s24 + $0x38] sm:$0xff]  ;;  %v1901_v2 = vld [vmem:[%s3839_s24 + $0x20] sm:$0xff] }
  0xcd   : > { %1804 = vmatpush.bf16.msra.mxu2 %v2685_v18  ;;  %v2545_v18 = vor.u32 %v3130_v10, %v2542_v11  ;;  %v1900_v7 = vld [vmem:[%s3839_s24 + $0x18] sm:$0xff]  ;;  %v1897_v9 = vld [vmem:[%s3839_s24] sm:$0xff]  ;;  %v1898_v11 = vld [vmem:[%s3839_s24 + $0x8] sm:$0xff] }
  0xce   : > { %1779 = vmatmul.bf16.vlgmr.msra.gmra.mxu0 %v3523_v45  ;;  %v2809_v45 = vor.u32 %v3196_v41, %v2806_v42  ;;  %v3214_v42 = vld [vmem:[%s3405_s22 + $0x494] sm:$0xf] }
  0xcf   : > { %1823 = vmatpush.bf16.msrb.mxu0 %v2473_v20  ;;  %1817 = vmatpush.bf16.msra.mxu3 %v2877_v24  ;;  %v2737_v20 = vor.u32 %v3178_v13, %v2734_v14  ;;  %v2929_v24 = vor.u32 %v3226_v15, %v2926_v16  ;;  %v1894_v13 = vld [vmem:[%s3964_s3] sm:$0xff] }
  0xd0   : > { %1836 = vmatpush.bf16.msrb.mxu1 %v2665_v21  ;;  %1805 = vmatmul.bf16.vlgmr.msra.gmra.mxu2 %v3527_v47  ;;  %v3142_v47 = vld [vmem:[%s3405_s22 + $0x254] sm:$0xf]  ;;  %v2326_v21 = vld [vmem:[%s3405_s22 + $0x58] sm:$0xf0] }
  0xd1   : > { %1849 = vmatpush.bf16.msrb.mxu2 %v2857_v23  ;;  %1792 = vmatmul.bf16.vlgmr.msra.gmra.mxu1 %v3525_v46  ;;  %v2398_v46 = vld [vmem:[%s3405_s22 + $0xe8] sm:$0xf0]  ;;  %v2518_v23 = vld [vmem:[%s3405_s22 + $0x1d8] sm:$0xf0]  ;;  %v2329_v29 = vor.u32 %v3076_v19, %v2326_v21  ;;  %v1572_v32 = vpop.f32.mrf.mxu0 }
  0xd2   : > { %3054 = vmatmul.msk.bf16.vlgmr.msra.gmra.mxu3 %vm1541_vm1, %v3532_v51  ;;  %v2401_v58 = vor.u32 %v3094_v50, %v2398_v46  ;;  %v2593_v51 = vor.u32 %v3142_v47, %v2590_v52  ;;  %v1585_v37 = vpop.f32.mrf.mxu1  ;;  %v2881_v50 = vor.u32 %v3214_v42, %v2878_v43  ;;  %v1910_v46 = vld [vmem:[%s3839_s24 + $0x68] sm:$0x7f] }
  0xd3   : > { %1862 = vmatpush.bf16.msrb.mxu3 %v1561_v30  ;;  %1824 = vmatpush.bf16.msrb.mxu0 %v2449_v33  ;;  %v2521_v30 = vor.u32 %v3124_v22, %v2518_v23  ;;  %v2713_v33 = vor.u32 %v3172_v25, %v2710_v26  ;;  %v1586_v41 = vadd.f32 %v1585_v37, %v1572_v32  ;;  %v1896_v23 = vld [vmem:[%s3964_s3 + $0x10] sm:$0xff] }
  0xd4   : > { %1837 = vmatpush.bf16.msrb.mxu1 %v2641_v34  ;;  %v2302_v34 = vld [vmem:[%s3405_s22 + $0x28] sm:$0xf0] }
  0xd5   : > { %1850 = vmatpush.bf16.msrb.mxu2 %v2833_v36  ;;  %v2494_v36 = vld [vmem:[%s3405_s22 + $0x1a8] sm:$0xf0]  ;;  %v2305_v44 = vor.u32 %v3070_v31, %v2302_v34 }
  0xd7   : > { %1863 = vmatpush.bf16.msrb.mxu3 %v3025_v40  ;;  %1825 = vmatpush.bf16.msrb.mxu0 %v2425_v48  ;;  %v2686_v40 = vld [vmem:[%s3405_s22 + $0x328] sm:$0xf0]  ;;  %v2497_v48 = vor.u32 %v3118_v35, %v2494_v36  ;;  %s370_s22 = scalar_lea.vmem %s3963_s2, %s3263_s19 }
  0xd8   : > { %1838 = vmatpush.bf16.msrb.mxu1 %v2617_v49  ;;  %v2689_v49 = vor.u32 %v3166_v39, %v2686_v40 }
  0xd9   : > { %1851 = vmatpush.bf16.msrb.mxu2 %v2809_v45  ;;  %v1909_v45 = vld [vmem:[%s3839_s24 + $0x60] sm:$0x7f]  ;;  %v1574_v47 = vpop.f32.mrf.mxu0  ;;  %v1598_v52 = vpop.f32.mrf.mxu2 }
  0xda   : > { %v1599_v54 = vadd.f32 %v1598_v52, %v1586_v41  ;;  %v1587_v55 = vpop.f32.mrf.mxu1  ;;  %v1611_v56 = vpop.f32.mrf.mxu3 }
  0xdb   : > { %1864 = vmatpush.bf16.msrb.mxu3 %v3001_v53  ;;  %1826 = vmatpush.bf16.msrb.mxu0 %v2401_v58  ;;  %v1907_v53 = vld [vmem:[%s3839_s24 + $0x50] sm:$0xff]  ;;  %v3289_v58 = vld [vmem:[#allocation1] sm:$0xff] }
  0xdc   : > { %1839 = vmatpush.bf16.msrb.mxu1 %v2593_v51  ;;  %v3290_v51 = vld [vmem:[#allocation1 + $0x9] sm:$0xff] }
  0xdd   : > { %1852 = vmatpush.bf16.msrb.mxu2 %v2785_v60  ;;  %v3846_v60 = vadd.f32 %v1611_v56, %v1599_v54 }
  0xdf   : > { %1865 = vmatpush.bf16.msrb.mxu3 %v2977_v0  ;;  %1827 = vmatpush.bf16.msrb.mxu0 %v2377_v5  ;;  %v1903_v0 = vld [vmem:[%s3839_s24 + $0x30] sm:$0xff] }
  0xe0   : > { %1840 = vmatpush.bf16.msrb.mxu1 %v2569_v6  ;;  %v1899_v5 = vld [vmem:[%s3839_s24 + $0x10] sm:$0xff] }
  0xe1   : > { %1853 = vmatpush.bf16.msrb.mxu2 %v2761_v8  ;;  %v1600_v4 = vpop.f32.mrf.mxu2 }
  0xe2   : > { %v1613_v6 = vpop.f32.mrf.mxu3 }
  0xe3   : > { %1866 = vmatpush.bf16.msrb.mxu3 %v2953_v12  ;;  %1828 = vmatpush.bf16.msrb.mxu0 %v2353_v17 }
  0xe4   : > { %1841 = vmatpush.bf16.msrb.mxu1 %v2545_v18 }
  0xe5   : > { %1854 = vmatpush.bf16.msrb.mxu2 %v2737_v20  ;;  %v1895_v20 = vld [vmem:[%s3964_s3 + $0x8] sm:$0xff] }
  0xe7   : > { %1867 = vmatpush.bf16.msrb.mxu3 %v2929_v24  ;;  %1829 = vmatpush.bf16.msrb.mxu0 %v2329_v29 }
  0xe8   : > { %1842 = vmatpush.bf16.msrb.mxu1 %v2521_v30 }
  0xe9   : > { %1855 = vmatpush.bf16.msrb.mxu2 %v2713_v33 }
  0xeb   : > { %1868 = vmatpush.bf16.msrb.mxu3 %v2905_v38  ;;  %1830 = vmatpush.bf16.msrb.mxu0 %v2305_v44  ;;  %v1624_v8 = vpop.f32.mrf.mxu0 }
  0xec   : > { %1843 = vmatpush.bf16.msrb.mxu1 %v2497_v48 }
  0xed   : > { %1856 = vmatpush.bf16.msrb.mxu2 %v2689_v49 }
  0xee   : > { %1831 = vmatmul.bf16.vlgmr.msrb.gmra.mxu0 %v3289_v58  ;;  %v1637_v10 = vpop.f32.mrf.mxu1 }
  0xef   : > { %3056 = vmatpush.msk.msra.mxu0 %vm1921_vm2, %v1909_v45  ;;  %1869 = vmatpush.bf16.msrb.mxu3 %v2881_v50  ;;  %v1638_v12 = vadd.f32 %v1637_v10, %v1624_v8 }
  0xf0   : > { %3060 = vmatpush.msk.msra.mxu1 %vm1921_vm2, %v1910_v46  ;;  %1857 = vmatmul.bf16.vlgmr.msrb.gmra.mxu2 %v3291_v61 }
  0xf1   : > { %1844 = vmatmul.bf16.vlgmr.msrb.gmra.mxu1 %v3290_v51  ;;  %1938 = vmatpush.msra.mxu0 %v1907_v53 }
  0xf2   : > { %3055 = vmatmul.msk.bf16.vlgmr.msrb.gmra.mxu3 %vm1541_vm1, %v3292_v63  ;;  %1964 = vmatpush.msra.mxu1 %v1908_v57  ;;  %v384_v57 = vld [vmem:[%s370_s22] sm:$0x3f] }
  0xf3   : > { %1939 = vmatpush.msra.mxu0 %v1905_v59  ;;  %v1626_v14 = vpop.f32.mrf.mxu0  ;;  %v1650_v15 = vpop.f32.mrf.mxu2  ;;  %v1878_v58 = vperm.slane %v384_v57, 2  ;;  %v1879_v51 = vperm.slane %v384_v57, 3 }
  0xf4   : > { %1965 = vmatpush.msra.mxu1 %v1906_v62  ;;  %v1651_v16 = vadd.f32 %v1650_v15, %v1638_v12 }
  0xf5   : > { %1940 = vmatpush.msra.mxu0 %v1903_v0  ;;  %v1663_v18 = vpop.f32.mrf.mxu3 }
  0xf6   : > { %1966 = vmatpush.msra.mxu1 %v1904_v1  ;;  %v1639_v17 = vpop.f32.mrf.mxu1  ;;  %v3863_v19 = vadd.f32 %v1663_v18, %v1651_v16 }
  0xf7   : > { %1941 = vmatpush.msra.mxu0 %v1901_v2 }
  0xf8   : > { %1967 = vmatpush.msra.mxu1 %v1902_v3 }
  0xf9   : > { %1942 = vmatpush.msra.mxu0 %v1899_v5  ;;  %v1876_v5 = vperm.slane %v384_v57, 0 }
  0xfa   : > { %1968 = vmatpush.msra.mxu1 %v1900_v7  ;;  %v1877_v7 = vperm.slane %v384_v57, 1 }
  0xfb   : > { %1943 = vmatpush.msra.mxu0 %v1897_v9  ;;  %v1652_v21 = vpop.f32.mrf.mxu2  ;;  %v1880_v9 = vperm.slane %v384_v57, 4  ;;  %v1888_v14 = vadd.f32 %v1876_v5, %v3846_v60 }
  0xfc   : > { %1969 = vmatpush.msra.mxu1 %v1898_v11  ;;  %v1889_v15 = vadd.f32 %v1877_v7, %v3863_v19 }
  0xfd   : > { %v1665_v22 = vpop.f32.mrf.mxu3 }
  0xfe   : > { %3057 = vmatmul.msk.f32.vlgmr.msra.gmra.mxu0 %vm1911_vm3, %v1894_v13 }
 0x101   : > { %3061 = vmatmul.msk.f32.vlgmr.msra.gmra.mxu1 %vm1911_vm3, %v1894_v13  ;;  %v1881_v13 = vperm.slane %v384_v57, 5 }
 0x106   : > { %3058 = vmatmul.msk.f32.gmra.mxu0 %vm1911_vm3, %v1895_v20 }
 0x109   : > { %3062 = vmatmul.msk.f32.gmra.mxu1 %vm1911_vm3, %v1895_v20 }
 0x10b   : > { %v1676_v24 = vpop.f32.mrf.mxu0 }
 0x10e   : > { %3059 = vmatmul.msk.f32.gmra.mxu0 %vm1911_vm3, %v1896_v23  ;;  %v1689_v25 = vpop.f32.mrf.mxu1 }
 0x10f   : > { %v1690_v26 = vadd.f32 %v1689_v25, %v1676_v24 }
 0x111   : > { %3063 = vmatmul.msk.f32.gmra.mxu1 %vm1911_vm3, %v1896_v23 }
 0x113   : > { %v1702_v27 = vpop.f32.mrf.mxu2  ;;  %v1678_v28 = vpop.f32.mrf.mxu0 }
 0x114   : > { %v1703_v29 = vadd.f32 %v1702_v27, %v1690_v26  ;;  %v1982_v26 = vrot.slane %v1888_v14, 6  ;;  %v1983_v28 = vrot.slane %v1889_v15, 6 }
 0x115   : > { %v1715_v31 = vpop.f32.mrf.mxu3 }
 0x116   : > { %v1691_v30 = vpop.f32.mrf.mxu1  ;;  %v1716_v32 = vadd.f32 %v1715_v31, %v1703_v29  ;;  %v1986_v31 = vrot.slane %v1888_v14, 4 }
 0x118   : > { %v1890_v61 = vadd.f32 %v1878_v58, %v1716_v32  ;;  %v1991_v32 = vsel %vm1990_vm4, %v1888_v14, %v1982_v26 }
 0x11a   : > { %v1998_v8 = vrot.slane %v1890_v61, 6  ;;  %v2002_v16 = vrot.slane %v1890_v61, 4 }
 0x11b   : > { %v1704_v33 = vpop.f32.mrf.mxu2 }
 0x11c   : > { %v2006_v21 = vsel %vm1990_vm4, %v1890_v61, %v1998_v8 }
 0x11d   : > { %v1717_v34 = vpop.f32.mrf.mxu3  ;;  %v2008_v60 = vsel %vm1993_vm5, %v2006_v21, %v2002_v16 }
 0x11e   : > { %v2028_v33 = vrot.slane %v2008_v60, 2 }
 0x12b   : > { %v1728_v35 = vpop.f32.mrf.mxu0 }
 0x12e   : > { %v1741_v36 = vpop.f32.mrf.mxu1 }
 0x12f   : > { %v1742_v37 = vadd.f32 %v1741_v36, %v1728_v35  ;;  %v1987_v35 = vrot.slane %v1889_v15, 4 }
 0x133   : > { %v1730_v38 = vpop.f32.mrf.mxu0  ;;  %v1754_v39 = vpop.f32.mrf.mxu2 }
 0x134   : > { %v1755_v40 = vadd.f32 %v1754_v39, %v1742_v37  ;;  %v1992_v38 = vsel %vm1990_vm4, %v1889_v15, %v1983_v28 }
 0x135   : > { %v1767_v42 = vpop.f32.mrf.mxu3 }
 0x136   : > { %v1743_v41 = vpop.f32.mrf.mxu1  ;;  %v1768_v43 = vadd.f32 %v1767_v42, %v1755_v40 }
 0x138   : > { %v1891_v63 = vadd.f32 %v1879_v51, %v1768_v43 }
 0x13a   : > { %v1999_v10 = vrot.slane %v1891_v63, 6  ;;  %v2003_v17 = vrot.slane %v1891_v63, 4 }
 0x13b   : > { %v1756_v44 = vpop.f32.mrf.mxu2 }
 0x13c   : > { %v2007_v22 = vsel %vm1990_vm4, %v1891_v63, %v1999_v10 }
 0x13d   : > { %v1769_v48 = vpop.f32.mrf.mxu3  ;;  %v2009_v19 = vsel %vm1993_vm5, %v2007_v22, %v2003_v17 }
 0x13e   : > { %v2029_v34 = vrot.slane %v2009_v19, 2 }
 0x14b   : > { %v1780_v49 = vpop.f32.mrf.mxu0 }
 0x14e   : > { %v1793_v50 = vpop.f32.mrf.mxu1 }
 0x14f   : > { %v1794_v59 = vadd.f32 %v1793_v50, %v1780_v49  ;;  %v1994_v50 = vsel %vm1993_vm5, %v1991_v32, %v1986_v31 }
 0x153   : > { %v1806_v45 = vpop.f32.mrf.mxu2  ;;  %v1782_v46 = vpop.f32.mrf.mxu0 }
 0x154   : > { %v1807_v0 = vadd.f32 %v1806_v45, %v1794_v59  ;;  %v1995_v45 = vsel %vm1993_vm5, %v1992_v38, %v1987_v35 }
 0x155   : > { %v1819_v52 = vpop.f32.mrf.mxu3 }
 0x156   : > { %v1795_v47 = vpop.f32.mrf.mxu1  ;;  %v1820_v11 = vadd.f32 %v1819_v52, %v1807_v0 }
 0x158   : > { %v1892_v18 = vadd.f32 %v1880_v9, %v1820_v11 }
 0x15a   : > { %v2012_v29 = vrot.slane %v1892_v18, 6  ;;  %v2016_v36 = vrot.slane %v1892_v18, 4 }
 0x15b   : > { %v1808_v53 = vpop.f32.mrf.mxu2 }
 0x15c   : > { %v2020_v41 = vsel %vm1990_vm4, %v1892_v18, %v2012_v29 }
 0x15d   : > { %v1821_v54 = vpop.f32.mrf.mxu3  ;;  %v2022_v46 = vsel %vm1993_vm5, %v2020_v41, %v2016_v36 }
 0x15e   : > { %v2052_v51 = vrot.slane %v2022_v46, 4 }
 0x16b   : > { %v1832_v55 = vpop.f32.mrf.mxu0 }
 0x16e   : > { %v1845_v56 = vpop.f32.mrf.mxu1 }
 0x16f   : > { %v1846_v62 = vadd.f32 %v1845_v56, %v1832_v55 }
 0x173   : > { %v1858_v1 = vpop.f32.mrf.mxu2  ;;  %v1834_v3 = vpop.f32.mrf.mxu0 }
 0x174   : > { %v1859_v2 = vadd.f32 %v1858_v1, %v1846_v62 }
 0x175   : > { %v1871_v6 = vpop.f32.mrf.mxu3 }
 0x176   : > { %v1847_v4 = vpop.f32.mrf.mxu1  ;;  %v1872_v12 = vadd.f32 %v1871_v6, %v1859_v2 }
 0x178   : > { %v1893_v20 = vadd.f32 %v1881_v13, %v1872_v12 }
 0x17a   : > { %v2013_v30 = vrot.slane %v1893_v20, 6  ;;  %v2017_v37 = vrot.slane %v1893_v20, 4 }
 0x17b   : > { %v1860_v23 = vpop.f32.mrf.mxu2  ;;  %v1945_v24 = vpop.f32.mrf.mxu0 }
 0x17c   : > { %v2032_v39 = vmul.f32 %v2028_v33, %v1945_v24  ;;  %v2021_v42 = vsel %vm1990_vm4, %v1893_v20, %v2013_v30  ;;  %v2024_v56 = vmul.f32 %v1994_v50, %v1945_v24 }
 0x17d   : > { %v1873_v27 = vpop.f32.mrf.mxu3  ;;  %v2023_v47 = vsel %vm1993_vm5, %v2021_v42, %v2017_v37 }
 0x17e   : > { %v1971_v25 = vpop.f32.mrf.mxu1  ;;  %v2040_v52 = vrot.slane %v2032_v39, 6  ;;  %v2053_v61 = vrot.slane %v2023_v47, 4 }
 0x17f   : > { %v2033_v40 = vmul.f32 %v2029_v34, %v1971_v25  ;;  %v2025_v57 = vmul.f32 %v1995_v45, %v1971_v25 }
 0x181   : > { %v2043_v53 = vrot.slane %v2033_v40, 6 }
 0x183   : > { %v1948_v43 = vpop.f32.mrf.mxu0 }
 0x184   : > { %v2034_v48 = vmul.f32 %v2028_v33, %v1948_v43  ;;  %v2056_v0 = vmul.f32 %v2052_v51, %v1948_v43 }
 0x186   : > { %v1974_v44 = vpop.f32.mrf.mxu1  ;;  %v2041_v54 = vrot.slane %v2034_v48, 6  ;;  %v2064_v6 = vrot.slane %v2056_v0, 4 }
 0x187   : > { %v2035_v49 = vmul.f32 %v2029_v34, %v1974_v44  ;;  %v2057_v1 = vmul.f32 %v2053_v61, %v1974_v44 }
 0x188   : > { %v2042_v58 = vsel %vm1990_vm4, %v2040_v52, %v2041_v54 }
 0x189   : > { %v2044_v55 = vrot.slane %v2035_v49, 6  ;;  %v2048_v62 = vadd.f32 %v2042_v58, %v2024_v56  ;;  %v2067_v7 = vrot.slane %v2057_v1, 4 }
 0x18b   : > { %v2045_v59 = vsel %vm1990_vm4, %v2043_v53, %v2044_v55  ;;  %v1951_v2 = vpop.f32.mrf.mxu0 }
 0x18c   : > { %v2049_v63 = vadd.f32 %v2045_v59, %v2025_v57  ;;  %v2058_v4 = vmul.f32 %v2052_v51, %v1951_v2  ;;  %v2076_v13 = vrot.slane %v1951_v2, 2 }
 0x18e   : > { %v1977_v3 = vpop.f32.mrf.mxu1  ;;  %v2065_v8 = vrot.slane %v2058_v4, 4 }
 0x18f   : > { %v2059_v5 = vmul.f32 %v2053_v61, %v1977_v3  ;;  %v2077_v15 = vrot.slane %v1977_v3, 2 }
 0x190   : > { %v2066_v10 = vsel %vm1993_vm5, %v2064_v6, %v2065_v8 }
 0x191   : > { %v2068_v9 = vrot.slane %v2059_v5, 4  ;;  %v2072_v12 = vadd.f32 %v2066_v10, %v2048_v62 }
 0x193   : > { %v2069_v11 = vsel %vm1993_vm5, %v2067_v7, %v2068_v9  ;;  %v3901_v16 = vadd.f32 %v2076_v13, %v2072_v12 }
 0x194   : > { %v2073_v14 = vadd.f32 %v2069_v11, %v2049_v63  ;;  %2087 = sbr.rel (%p3064_p11) target bundleno = 411 (0x19b), region = 71 }
 0x195   : > { %2082 = vst [vmem:[%s382_s9] sm:$0x3f] %v3901_v16 }
 0x196   : > { %v3903_v17 = vadd.f32 %v2077_v15, %v2073_v14 }
 0x198   : > { %2083 = vst [vmem:[%s382_s9 + $0x8] sm:$0x3f] %v3903_v17 }
 0x199   : > { %vm2088_vm6 = vcmask 111616   ;;  %v3317_v18 = vmov 0.0  }
 0x19a   : > { %2089 = vst.msk [vmem:[%s3968_s7] sm:$0x3f] %vm2088_vm6, %v3317_v18 }
 0x19b PF: > { %v2106_v20 = vld [vmem:[%s3410_s29 + $0x78] sm:$0xff]  ;;  %v2105_v22 = vld [vmem:[%s3410_s29 + $0x70] sm:$0xff]  ;;  %v2104_v24 = vld [vmem:[%s3410_s29 + $0x68] sm:$0xff]  ;;  %vm2164_vm7 = vcmask 111616  }
 0x19c   : > { %v2122_v21 = vld [vmem:[%s3410_s29 + $0xf8] sm:$0xff]  ;;  %2123 = vmatpush.msra.mxu2 %v2106_v20  ;;  %v2121_v23 = vld [vmem:[%s3410_s29 + $0xf0] sm:$0xff]  ;;  %v2120_v25 = vld [vmem:[%s3410_s29 + $0xe8] sm:$0xff] }
 0x19d   : > { %2143 = vmatpush.msra.mxu3 %v2122_v21  ;;  %v2103_v26 = vld [vmem:[%s3410_s29 + $0x60] sm:$0xff]  ;;  %v2102_v28 = vld [vmem:[%s3410_s29 + $0x58] sm:$0xff]  ;;  %v2101_v19 = vld [vmem:[%s3410_s29 + $0x50] sm:$0xff] }
 0x19e   : > { %2124 = vmatpush.msra.mxu2 %v2105_v22  ;;  %v2119_v27 = vld [vmem:[%s3410_s29 + $0xe0] sm:$0xff]  ;;  %v2118_v60 = vld [vmem:[%s3410_s29 + $0xd8] sm:$0xff]  ;;  %v2117_v29 = vld [vmem:[%s3410_s29 + $0xd0] sm:$0xff] }
 0x19f   : > { %2144 = vmatpush.msra.mxu3 %v2121_v23  ;;  %v2100_v30 = vld [vmem:[%s3410_s29 + $0x48] sm:$0xff]  ;;  %v2099_v32 = vld [vmem:[%s3410_s29 + $0x40] sm:$0xff]  ;;  %v2098_v34 = vld [vmem:[%s3410_s29 + $0x38] sm:$0xff] }
 0x1a0   : > { %2125 = vmatpush.msra.mxu2 %v2104_v24  ;;  %v2116_v31 = vld [vmem:[%s3410_s29 + $0xc8] sm:$0xff]  ;;  %v2115_v33 = vld [vmem:[%s3410_s29 + $0xc0] sm:$0xff]  ;;  %v2114_v35 = vld [vmem:[%s3410_s29 + $0xb8] sm:$0xff] }
 0x1a1   : > { %2145 = vmatpush.msra.mxu3 %v2120_v25  ;;  %v2097_v36 = vld [vmem:[%s3410_s29 + $0x30] sm:$0xff]  ;;  %v2096_v38 = vld [vmem:[%s3410_s29 + $0x28] sm:$0xff]  ;;  %v2095_v40 = vld [vmem:[%s3410_s29 + $0x20] sm:$0xff] }
 0x1a2   : > { %2126 = vmatpush.msra.mxu2 %v2103_v26  ;;  %v2113_v37 = vld [vmem:[%s3410_s29 + $0xb0] sm:$0xff]  ;;  %v2112_v39 = vld [vmem:[%s3410_s29 + $0xa8] sm:$0xff]  ;;  %v2111_v41 = vld [vmem:[%s3410_s29 + $0xa0] sm:$0xff] }
 0x1a3   : > { %2146 = vmatpush.msra.mxu3 %v2119_v27  ;;  %v2094_v42 = vld [vmem:[%s3410_s29 + $0x18] sm:$0xff]  ;;  %v2093_v44 = vld [vmem:[%s3410_s29 + $0x10] sm:$0xff]  ;;  %v2092_v49 = vld [vmem:[%s3410_s29 + $0x8] sm:$0xff] }
 0x1a4   : > { %2127 = vmatpush.msra.mxu2 %v2102_v28  ;;  %v2110_v43 = vld [vmem:[%s3410_s29 + $0x98] sm:$0xff]  ;;  %v2109_v48 = vld [vmem:[%s3410_s29 + $0x90] sm:$0xff]  ;;  %v2108_v50 = vld [vmem:[%s3410_s29 + $0x88] sm:$0xff] }
 0x1a5   : > { %2147 = vmatpush.msra.mxu3 %v2118_v60  ;;  %v2091_v45 = vld [vmem:[%s3410_s29] sm:$0xff] }
 0x1a6   : > { %2128 = vmatpush.msra.mxu2 %v2101_v19  ;;  %v2107_v46 = vld [vmem:[%s3410_s29 + $0x80] sm:$0xff] }
 0x1a7   : > { %2148 = vmatpush.msra.mxu3 %v2117_v29  ;;  %v2090_v52 = vld [vmem:[%s3968_s7] sm:$0x3f] }
 0x1a8   : > { %2129 = vmatpush.msra.mxu2 %v2100_v30 }
 0x1a9   : > { %2149 = vmatpush.msra.mxu3 %v2116_v31 }
 0x1aa   : > { %2130 = vmatpush.msra.mxu2 %v2099_v32 }
 0x1ab   : > { %2150 = vmatpush.msra.mxu3 %v2115_v33 }
 0x1ac   : > { %2131 = vmatpush.msra.mxu2 %v2098_v34 }
 0x1ad   : > { %2151 = vmatpush.msra.mxu3 %v2114_v35 }
 0x1ae   : > { %2132 = vmatpush.msra.mxu2 %v2097_v36 }
 0x1af   : > { %2152 = vmatpush.msra.mxu3 %v2113_v37 }
 0x1b0   : > { %2133 = vmatpush.msra.mxu2 %v2096_v38 }
 0x1b1   : > { %2153 = vmatpush.msra.mxu3 %v2112_v39 }
 0x1b2   : > { %2134 = vmatpush.msra.mxu2 %v2095_v40 }
 0x1b3   : > { %2154 = vmatpush.msra.mxu3 %v2111_v41 }
 0x1b4   : > { %2135 = vmatpush.msra.mxu2 %v2094_v42 }
 0x1b5   : > { %2155 = vmatpush.msra.mxu3 %v2110_v43 }
 0x1b6   : > { %2136 = vmatpush.msra.mxu2 %v2093_v44 }
 0x1b7   : > { %2156 = vmatpush.msra.mxu3 %v2109_v48 }
 0x1b8   : > { %2137 = vmatpush.msra.mxu2 %v2092_v49 }
 0x1b9   : > { %2157 = vmatpush.msra.mxu3 %v2108_v50 }
 0x1ba   : > { %2138 = vmatpush.msra.mxu2 %v2091_v45 }
 0x1bb   : > { %2158 = vmatpush.msra.mxu3 %v2107_v46  ;;  %2139 = vmatmul.f32.vlgmr.msra.gmra.mxu2 %v3901_v16 }
 0x1bc   : > { %2159 = vmatmul.f32.vlgmr.msra.gmra.mxu3 %v3903_v17 }
 0x23e   : > { %v2140_v47 = vpop.f32.mrf.mxu2 }
 0x23f   : > { %v2160_v53 = vpop.f32.mrf.mxu3 }
 0x240   : > { %v2161_v54 = vadd.f32 %v2160_v53, %v2140_v47 }
 0x242   : > { %v2163_v55 = vadd.f32 %v2161_v54, %v2090_v52 }
 0x244   : > { %2165 = vst.msk [vmem:[%s3968_s7] sm:$0x3f] %vm2164_vm7, %v2163_v55 }
 0x245 PF: > { %p15_p12 = scmp.ge.s32.totalorder %s3377_s28, 4   ;;  %s3969_s24 = smov %s3311_s25 }
 0x246   : > { %s3970_s25 = smov %s3386_s8  ;;  %s3971_s26 = smov %s3377_s28 }
 0x247   :  { %17 = sbr.rel (!%p15_p12) target bundleno = 2 (0x2), region = 123 }

</bundles_post_ra>
